<compile_context>
chip_gen: v6e
topology: v6e:2x2x1
jax: 0.10.0
libtpu: 0.0.40
codegen_flags: <defaults>
</compile_context>

<pallas_src>
import math

import jax
import jax.numpy as jnp
from jax.experimental import pallas as pl
from jax.experimental.pallas import tpu as pltpu

NEG_INF = -1e30  # finite "minus infinity" (keeps exp/max free of inf/nan edge cases)


def _round_up(x, m):
    return (x + m - 1) // m * m


def _pad2(a, rows, cols):
    return jnp.pad(a, ((0, rows - a.shape[0]), (0, cols - a.shape[1])))


def _vmem_limit_bytes():
    # ~75% of this generation's physical VMEM (v5e/v6e: 128 MiB -> 96 MiB, v7x: 64 -> 48 MiB).
    try:
        cap = int(pltpu.get_tpu_info().vmem_capacity_bytes)
    except Exception:
        cap = 64 * 1024 * 1024
    return max(32 * 1024 * 1024, cap * 3 // 4)


def _pick_tile_v(v, ep, hp, bp, vmem_limit):
    """Largest 128-multiple vocab tile whose double-buffered stream fits the VMEM budget."""
    const_bytes = (
        (ep + hp) * 3 * hp * 2        # GRU weight slabs, bf16, single-buffered
        + 2 * 3 * hp * 4              # b_ih / b_hh, f32
        + bp * ep * 2 + bp * hp * 4   # x (bf16), h (f32)
        + 2 * bp * hp * 4             # h_new outputs (two per-core copies, f32)
        + bp * hp * 2                 # bf16 h_new scratch
        + 4 * 1024 * 1024             # slack (semaphores, spills, compiler scratch)
    )
    # per-column bytes of the streamed, double-buffered set: w_out (bf16) + b_out (f32) + logits (bf16)
    per_col = 2 * (hp * 2 + 4 + bp * 2)
    affordable = max(128, (vmem_limit - const_bytes) // per_col)
    cap_small = _round_up(max(1, pl.cdiv(v, 2)), 128)   # don't over-pad tiny vocabs
    tile = min(affordable, 8192, cap_small)
    return max(128, tile // 128 * 128)


def _decoder_step_kernel(
    x_ref, h_ref,              # (Bp, Ep) bf16, (Bp, Hp) f32
    wi_ref, wh_ref,            # (Ep, 3*Hp), (Hp, 3*Hp) bf16 — gates concatenated r|z|n
    bi_ref, bh_ref,            # (1, 3*Hp) f32 each
    wout_ref, bout_ref,        # (Hp, TILE_V) bf16, (1, TILE_V) f32 — streamed over V
    logits_ref, lse_ref, hnew_ref,   # outs: (Bp, TILE_V) bf16 streamed, (1, Bp, 1), (1, Bp, Hp)
    m_sc, l_sc, hb_sc,         # scratch: running max / sum-exp (f32), bf16 h_new cache
):
    j = pl.program_id(1)
    nj = pl.num_programs(1)
    hp = hb_sc.shape[-1]

    # ---- GRU cell: once per core; h_new cached (bf16) in VMEM for all vocab tiles ----
    @pl.when(j == 0)
    def _():
        x = x_ref[...]                                    # bf16
        h = h_ref[...]                                    # f32
        gi = jnp.dot(x, wi_ref[...],
                     preferred_element_type=jnp.float32) + bi_ref[...]
        gh = jnp.dot(h.astype(jnp.bfloat16), wh_ref[...],
                     preferred_element_type=jnp.float32) + bh_ref[...]
        r = jax.nn.sigmoid(gi[:, :hp] + gh[:, :hp])
        z = jax.nn.sigmoid(gi[:, hp:2 * hp] + gh[:, hp:2 * hp])
        n = jnp.tanh(gi[:, 2 * hp:] + r * gh[:, 2 * hp:])
        h_new = (1.0 - z) * n + z * h                     # f32
        hnew_ref[0] = h_new
        hb_sc[...] = h_new.astype(jnp.bfloat16)
        m_sc[...] = jnp.full_like(m_sc, NEG_INF)
        l_sc[...] = jnp.zeros_like(l_sc)

    # ---- output projection for this vocab tile (w_out tile streamed from HBM) ----
    logits = jnp.dot(hb_sc[...], wout_ref[...],
                     preferred_element_type=jnp.float32) + bout_ref[...]
    logits_ref[...] = logits.astype(logits_ref.dtype)     # lane-dense bf16 writeback

    # ---- online running max / sum-exp for this core's partial log-softmax denominator ----
    m_prev = m_sc[...]
    m_new = jnp.maximum(m_prev, jnp.max(logits, axis=-1, keepdims=True))
    l_sc[...] = (l_sc[...] * jnp.exp(m_prev - m_new)
                 + jnp.sum(jnp.exp(logits - m_new), axis=-1, keepdims=True))
    m_sc[...] = m_new

    @pl.when(j == nj - 1)
    def _():
        lse_ref[0] = m_sc[...] + jnp.log(l_sc[...])


def decoder_step_pallas(x_pad, h_pad, params, *, tile_v, single_buffer=True):
    bp, ep = x_pad.shape
    hp = h_pad.shape[-1]
    vp = params["w_out_t"].shape[-1]
    assert vp % (2 * tile_v) == 0
    n_half = vp // (2 * tile_v)
    vmem_limit = _vmem_limit_bytes()

    def const_spec(shape):
        # Block index never changes -> single buffer is enough (halves resident GRU-weight VMEM).
        if single_buffer and hasattr(pl, "Buffered"):
            return pl.BlockSpec(shape, lambda c, j: (0, 0), pipeline_mode=pl.Buffered(1))
        return pl.BlockSpec(shape, lambda c, j: (0, 0))

    grid_spec = pltpu.PrefetchScalarGridSpec(
        num_scalar_prefetch=0,
        grid=(2, n_half),                                     # (core split, vocab tiles per core)
        in_specs=[
            const_spec((bp, ep)),                             # x
            const_spec((bp, hp)),                             # h
            const_spec((ep, 3 * hp)),                         # W_i_cat (resident)
            const_spec((hp, 3 * hp)),                         # W_h_cat (resident)
            const_spec((1, 3 * hp)),                          # b_ih
            const_spec((1, 3 * hp)),                          # b_hh
            pl.BlockSpec((hp, tile_v), lambda c, j: (0, c * n_half + j)),   # W_out tile (streamed)
            pl.BlockSpec((1, tile_v), lambda c, j: (0, c * n_half + j)),    # b_out tile (streamed)
        ],
        out_specs=[
            pl.BlockSpec((bp, tile_v), lambda c, j: (0, c * n_half + j)),   # logits (streamed, bf16)
            pl.BlockSpec((1, bp, 1), lambda c, j: (c, 0, 0)),               # per-core partial lse
            pl.BlockSpec((1, bp, hp), lambda c, j: (c, 0, 0)),              # per-core h_new copy
        ],
        scratch_shapes=[
            pltpu.VMEM((bp, 1), jnp.float32),                 # running max
            pltpu.VMEM((bp, 1), jnp.float32),                 # running sum-exp
            pltpu.VMEM((bp, hp), jnp.bfloat16),               # cached bf16 h_new
        ],
    )

    cost = pl.CostEstimate(
        flops=int(2 * bp * hp * vp + 2 * 2 * bp * (ep + hp) * 3 * hp),
        transcendentals=int(bp * vp + 4 * bp * hp),
        bytes_accessed=int(hp * vp * 2 + vp * 4 + bp * vp * 2
                           + (ep + hp) * 3 * hp * 2 + 2 * 3 * hp * 4
                           + bp * ep * 2 + bp * hp * 4
                           + 2 * bp * hp * 4 + 2 * bp * 4),
    )

    kernel = pl.pallas_call(
        _decoder_step_kernel,
        out_shape=(
            jax.ShapeDtypeStruct((bp, vp), jnp.bfloat16),     # logits (bf16 cuts writeback traffic)
            jax.ShapeDtypeStruct((2, bp, 1), jnp.float32),    # per-core partial lse
            jax.ShapeDtypeStruct((2, bp, hp), jnp.float32),   # per-core h_new (identical copies)
        ),
        grid_spec=grid_spec,
        compiler_params=pltpu.CompilerParams(
            # vocab axis carries the online-softmax accumulators -> "arbitrary";
            # leading axis splits the w_out stream across TensorCores on dual-core parts.
            dimension_semantics=("parallel", "arbitrary"),
            vmem_limit_bytes=vmem_limit,
        ),
        cost_estimate=cost,
    )
    return kernel(
        x_pad, h_pad,
        params["w_i_cat"], params["w_h_cat"],
        params["b_i_cat"], params["b_h_cat"],
        params["w_out_t"], params["b_out"],
    )


def init_params(key, embedding_size, hidden_size, output_size, padding_idx=3, max_batch=16):
    """Synthetic parameters mirroring the PyTorch module's shapes & gate layout."""
    E, H, V = embedding_size, hidden_size, output_size
    Ep, Hp = _round_up(E, 128), _round_up(H, 128)
    Bp = _round_up(max(max_batch, 16), 16)

    # Pick TILE_V first from the per-generation VMEM budget, then pad the vocab up to a
    # multiple of 2*TILE_V (even number of tiles so the 2-core split always divides evenly).
    vmem_limit = _vmem_limit_bytes()
    tile_v = _pick_tile_v(V, Ep, Hp, Bp, vmem_limit)
    n_real = (V + tile_v - 1) // tile_v
    n_half = max(1, (n_real + 1) // 2)
    Vp = 2 * n_half * tile_v

    ks = jax.random.split(key, 7)
    bound = 1.0 / math.sqrt(H)

    def u(k, shape):
        return jax.random.uniform(k, shape, jnp.float32, -bound, bound)

    # nn.Embedding(V, E), padding_idx = 3 (that row zeroed).
    emb = jax.random.normal(ks[0], (V, E), jnp.float32)
    emb = emb.at[padding_idx].set(0.0)

    # nn.GRU(E, H) parameters, PyTorch layout: rows stacked [r; z; n].
    # (init_gru's orthogonal re-init of W_hh only changes initial values, not forward math.)
    w_ih = u(ks[1], (3 * H, E))
    w_hh = u(ks[2], (3 * H, H))
    b_ih = u(ks[3], (3 * H,))
    b_hh = u(ks[4], (3 * H,))
    # nn.Linear(H, V)
    w_out = u(ks[5], (V, H))
    b_out = u(ks[6], (V,))

    def cat_gates_t(w, in_pad):
        # (3H, in) -> (in_pad, 3*Hp) with per-gate column blocks [r | z | n].
        cols = [_pad2(w[g * H:(g + 1) * H, :].T, in_pad, Hp) for g in range(3)]
        return jnp.concatenate(cols, axis=1)

    def cat_gates_b(b):
        parts = [jnp.pad(b[g * H:(g + 1) * H], (0, Hp - H)) for g in range(3)]
        return jnp.concatenate(parts)[None, :]

    return {
        "embedding": jnp.pad(emb, ((0, 0), (0, Ep - E))).astype(jnp.bfloat16),
        "w_i_cat": cat_gates_t(w_ih, Ep).astype(jnp.bfloat16),   # (Ep, 3*Hp)
        "w_h_cat": cat_gates_t(w_hh, Hp).astype(jnp.bfloat16),   # (Hp, 3*Hp)
        "b_i_cat": cat_gates_b(b_ih),                            # (1, 3*Hp) f32
        "b_h_cat": cat_gates_b(b_hh),                            # (1, 3*Hp) f32
        "w_out_t": _pad2(w_out.T, Hp, Vp).astype(jnp.bfloat16),  # (Hp, Vp)
        # All padded vocab columns (real vocab kept at the start) get a very negative bias so
        # they vanish under softmax even in all-padding tiles.
        "b_out": jnp.full((Vp,), NEG_INF, jnp.float32).at[:V].set(b_out)[None, :],
        "dims": dict(E=E, H=H, V=V, Ep=Ep, Hp=Hp, Vp=Vp, tile_v=tile_v),
    }


def decoder_rnn_forward(tokens, hidden, params):
    """tokens: (B, 1) int32, hidden: (1, B, H) f32 -> (logp (B, V), hidden (1, B, H))."""
    d = params["dims"]
    B = tokens.shape[0]
    Bp = _round_up(max(B, 16), 16)   # bf16 sublane packing; padding is free (w_out-stream bound)

    # embedding(input).transpose(0, 1) -> (1, B, E); seq_len == 1 so use the (B, E) slab.
    x = jnp.take(params["embedding"], tokens[:, 0], axis=0)             # (B, Ep) bf16
    # F.dropout: eval-mode identity (see TODO at top).
    h = hidden[0]                                                       # (B, H) f32

    x_pad = jnp.pad(x, ((0, Bp - B), (0, 0)))
    h_pad = jnp.pad(h, ((0, Bp - B), (0, d["Hp"] - d["H"]))).astype(jnp.float32)

    try:
        logits_pad, lse_parts, h_new_parts = decoder_step_pallas(
            x_pad, h_pad, params, tile_v=d["tile_v"], single_buffer=True)
    except Exception:
        # Fallback if this JAX build rejects pl.Buffered(1) single-buffering.
        logits_pad, lse_parts, h_new_parts = decoder_step_pallas(
            x_pad, h_pad, params, tile_v=d["tile_v"], single_buffer=False)

    lse = jnp.logaddexp(lse_parts[0], lse_parts[1])                     # combine per-core partials
    logp = (logits_pad.astype(jnp.float32) - lse)[:B, :d["V"]]          # log_softmax finalize
    h_new = h_new_parts[0][:B, :d["H"]][None, :, :]
    return logp, h_new


def _reference(tokens, hidden, params):
    """Pure-JAX mirror of the kernel math (same bf16 matmuls / logits writeback, f32 accumulation)."""
    d = params["dims"]
    H, Hp, V = d["H"], d["Hp"], d["V"]
    x = jnp.take(params["embedding"], tokens[:, 0], axis=0)             # (B, Ep) bf16
    h = jnp.pad(hidden[0], ((0, 0), (0, Hp - H))).astype(jnp.float32)   # (B, Hp)

    gi = jnp.dot(x, params["w_i_cat"], preferred_element_type=jnp.float32) + params["b_i_cat"]
    gh = jnp.dot(h.astype(jnp.bfloat16), params["w_h_cat"],
                 preferred_element_type=jnp.float32) + params["b_h_cat"]
    r = jax.nn.sigmoid(gi[:, :Hp] + gh[:, :Hp])
    z = jax.nn.sigmoid(gi[:, Hp:2 * Hp] + gh[:, Hp:2 * Hp])
    n = jnp.tanh(gi[:, 2 * Hp:] + r * gh[:, 2 * Hp:])
    h_new = (1.0 - z) * n + z * h

    logits = jnp.dot(h_new.astype(jnp.bfloat16), params["w_out_t"],
                     preferred_element_type=jnp.float32) + params["b_out"]
    m = jnp.max(logits, axis=-1, keepdims=True)
    lse = m + jnp.log(jnp.sum(jnp.exp(logits - m), axis=-1, keepdims=True))
    logp = logits.astype(jnp.bfloat16).astype(jnp.float32) - lse        # mirror bf16 writeback
    return logp[:, :V], h_new[:, :H][None, :, :]


if __name__ == "__main__":
    B, E, H, V = 4, 64, 64, 320   # small, deliberately off-tile to exercise padding paths
    key = jax.random.PRNGKey(0)
    k_par, k_tok, k_hid = jax.random.split(key, 3)

    params = init_params(k_par, E, H, V, max_batch=B)
    tokens = jax.random.randint(k_tok, (B, 1), 0, V, dtype=jnp.int32)
    hidden = jax.random.normal(k_hid, (1, B, H), jnp.float32)

    logp, h_new = decoder_rnn_forward(tokens, hidden, params)
    jax.block_until_ready((logp, h_new))

    ref_logp, ref_h = _reference(tokens, hidden, params)
    assert logp.shape == (B, V) and h_new.shape == (1, B, H)
    assert jnp.allclose(h_new, ref_h, atol=2e-3, rtol=2e-3), "hidden state mismatch"
    assert jnp.allclose(logp, ref_logp, atol=1e-2, rtol=1e-2), "log_softmax mismatch"
    assert jnp.allclose(jnp.sum(jnp.exp(logp), axis=-1), 1.0, atol=5e-3), "logp not normalized"

    print("KERNEL_OK")
</pallas_src>

<mosaic_0001>
module attributes {stable_mosaic.version = 11 : i64} {
  func.func @_decoder_step_kernel(%arg0: i32, %arg1: i32, %arg2: memref<16x128xbf16, #tpu.memory_space<vmem>>, %arg3: memref<16x128xf32, #tpu.memory_space<vmem>>, %arg4: memref<128x384xbf16, #tpu.memory_space<vmem>>, %arg5: memref<128x384xbf16, #tpu.memory_space<vmem>>, %arg6: memref<1x384xf32, #tpu.memory_space<vmem>>, %arg7: memref<1x384xf32, #tpu.memory_space<vmem>>, %arg8: memref<128x256xbf16, #tpu.memory_space<vmem>>, %arg9: memref<1x256xf32, #tpu.memory_space<vmem>>, %arg10: memref<16x256xbf16, #tpu.memory_space<vmem>>, %arg11: memref<1x16x1xf32, #tpu.memory_space<vmem>>, %arg12: memref<1x16x128xf32, #tpu.memory_space<vmem>>, %arg13: memref<16x1xf32, #tpu.memory_space<vmem>>, %arg14: memref<16x1xf32, #tpu.memory_space<vmem>>, %arg15: memref<16x128xbf16, #tpu.memory_space<vmem>>) attributes {dimension_semantics = [#tpu.dimension_semantics<parallel>, #tpu.dimension_semantics<arbitrary>], iteration_bounds = array<i64: 2, 1>, scalar_prefetch = 0 : i64, scratch_operands = 3 : i64, tpu.core_type = #tpu.core_type<tc>, window_params = [{pipeline_mode = #tpu.pipeline_mode<synchronous>, transform_indices = @transform_0, window_bounds = array<i64: 16, 128>}, {pipeline_mode = #tpu.pipeline_mode<synchronous>, transform_indices = @transform_1, window_bounds = array<i64: 16, 128>}, {pipeline_mode = #tpu.pipeline_mode<synchronous>, transform_indices = @transform_2, window_bounds = array<i64: 128, 384>}, {pipeline_mode = #tpu.pipeline_mode<synchronous>, transform_indices = @transform_3, window_bounds = array<i64: 128, 384>}, {pipeline_mode = #tpu.pipeline_mode<synchronous>, transform_indices = @transform_4, window_bounds = array<i64: 1, 384>}, {pipeline_mode = #tpu.pipeline_mode<synchronous>, transform_indices = @transform_5, window_bounds = array<i64: 1, 384>}, {transform_indices = @transform_6, window_bounds = array<i64: 128, 256>}, {transform_indices = @transform_7, window_bounds = array<i64: 1, 256>}, {transform_indices = @transform_8, window_bounds = array<i64: 16, 256>}, {transform_indices = @transform_9, window_bounds = array<i64: 1, 16, 1>}, {transform_indices = @transform_10, window_bounds = array<i64: 1, 16, 128>}]} {
    %c0_i32 = arith.constant 0 : i32
    %0 = arith.cmpi eq, %arg1, %c0_i32 : i32
    %1 = arith.extui %0 : i1 to i32
    %c0_i32_0 = arith.constant 0 : i32
    %2 = arith.cmpi ne, %1, %c0_i32_0 : i32
    scf.if %2 {
      %c0_20 = arith.constant 0 : index
      %c0_21 = arith.constant 0 : index
      %30 = vector.load %arg2[%c0_20, %c0_21] : memref<16x128xbf16, #tpu.memory_space<vmem>>, vector<16x128xbf16>
      %c0_22 = arith.constant 0 : index
      %c0_23 = arith.constant 0 : index
      %31 = vector.load %arg3[%c0_22, %c0_23] : memref<16x128xf32, #tpu.memory_space<vmem>>, vector<16x128xf32>
      %c0_24 = arith.constant 0 : index
      %c0_25 = arith.constant 0 : index
      %32 = vector.load %arg4[%c0_24, %c0_25] : memref<128x384xbf16, #tpu.memory_space<vmem>>, vector<128x384xbf16>
      %cst_26 = arith.constant dense<0.000000e+00> : vector<16x384xf32>
      %33 = tpu.matmul %30, %32, %cst_26 {dimension_numbers = #tpu.dot_dimension_numbers<[1], [0], [0], [1], [0, 0, 1, 1], [], []>} : vector<16x128xbf16>, vector<128x384xbf16>, vector<16x384xf32> -> vector<16x384xf32>
      %c0_27 = arith.constant 0 : index
      %c0_28 = arith.constant 0 : index
      %34 = vector.load %arg6[%c0_27, %c0_28] : memref<1x384xf32, #tpu.memory_space<vmem>>, vector<1x384xf32>
      %35 = vector.broadcast %34 : vector<1x384xf32> to vector<16x384xf32>
      %36 = arith.addf %33, %35 : vector<16x384xf32>
      %37 = arith.truncf %31 : vector<16x128xf32> to vector<16x128xbf16>
      %c0_29 = arith.constant 0 : index
      %c0_30 = arith.constant 0 : index
      %38 = vector.load %arg5[%c0_29, %c0_30] : memref<128x384xbf16, #tpu.memory_space<vmem>>, vector<128x384xbf16>
      %cst_31 = arith.constant dense<0.000000e+00> : vector<16x384xf32>
      %39 = tpu.matmul %37, %38, %cst_31 {dimension_numbers = #tpu.dot_dimension_numbers<[1], [0], [0], [1], [0, 0, 1, 1], [], []>} : vector<16x128xbf16>, vector<128x384xbf16>, vector<16x384xf32> -> vector<16x384xf32>
      %c0_32 = arith.constant 0 : index
      %c0_33 = arith.constant 0 : index
      %40 = vector.load %arg7[%c0_32, %c0_33] : memref<1x384xf32, #tpu.memory_space<vmem>>, vector<1x384xf32>
      %41 = vector.broadcast %40 : vector<1x384xf32> to vector<16x384xf32>
      %42 = arith.addf %39, %41 : vector<16x384xf32>
      %43 = vector.extract_strided_slice %36 {offsets = [0, 0], sizes = [16, 128], strides = [1, 1]} : vector<16x384xf32> to vector<16x128xf32>
      %44 = vector.extract_strided_slice %42 {offsets = [0, 0], sizes = [16, 128], strides = [1, 1]} : vector<16x384xf32> to vector<16x128xf32>
      %45 = arith.addf %43, %44 : vector<16x128xf32>
      %46 = arith.negf %45 : vector<16x128xf32>
      %47 = math.exp %46 : vector<16x128xf32>
      %cst_34 = arith.constant 1.000000e+00 : f32
      %48 = vector.broadcast %cst_34 : f32 to vector<16x128xf32>
      %49 = arith.addf %48, %47 : vector<16x128xf32>
      %50 = arith.divf %48, %49 : vector<16x128xf32>
      %51 = vector.extract_strided_slice %36 {offsets = [0, 128], sizes = [16, 128], strides = [1, 1]} : vector<16x384xf32> to vector<16x128xf32>
      %52 = vector.extract_strided_slice %42 {offsets = [0, 128], sizes = [16, 128], strides = [1, 1]} : vector<16x384xf32> to vector<16x128xf32>
      %53 = arith.addf %51, %52 : vector<16x128xf32>
      %54 = arith.negf %53 : vector<16x128xf32>
      %55 = math.exp %54 : vector<16x128xf32>
      %cst_35 = arith.constant 1.000000e+00 : f32
      %56 = vector.broadcast %cst_35 : f32 to vector<16x128xf32>
      %57 = arith.addf %56, %55 : vector<16x128xf32>
      %58 = arith.divf %56, %57 : vector<16x128xf32>
      %59 = vector.extract_strided_slice %36 {offsets = [0, 256], sizes = [16, 128], strides = [1, 1]} : vector<16x384xf32> to vector<16x128xf32>
      %60 = vector.extract_strided_slice %42 {offsets = [0, 256], sizes = [16, 128], strides = [1, 1]} : vector<16x384xf32> to vector<16x128xf32>
      %61 = arith.mulf %50, %60 : vector<16x128xf32>
      %62 = arith.addf %59, %61 : vector<16x128xf32>
      %63 = math.tanh %62 : vector<16x128xf32>
      %cst_36 = arith.constant 1.000000e+00 : f32
      %64 = vector.broadcast %cst_36 : f32 to vector<16x128xf32>
      %65 = arith.subf %64, %58 : vector<16x128xf32>
      %66 = arith.mulf %65, %63 : vector<16x128xf32>
      %67 = arith.mulf %58, %31 : vector<16x128xf32>
      %68 = arith.addf %66, %67 : vector<16x128xf32>
      %c0_37 = arith.constant 0 : index
      %c0_38 = arith.constant 0 : index
      %c0_39 = arith.constant 0 : index
      %69 = vector.load %arg12[%c0_37, %c0_38, %c0_39] : memref<1x16x128xf32, #tpu.memory_space<vmem>>, vector<1x16x128xf32>
      %70 = vector.shape_cast %69 : vector<1x16x128xf32> to vector<16x128xf32>
      %71 = vector.shape_cast %68 : vector<16x128xf32> to vector<1x16x128xf32>
      tpu.vector_store %arg12[%c0_37, %c0_38, %c0_39], %71 {strides = array<i32>} : memref<1x16x128xf32, #tpu.memory_space<vmem>>, vector<1x16x128xf32>,
      %72 = arith.truncf %68 : vector<16x128xf32> to vector<16x128xbf16>
      %c0_40 = arith.constant 0 : index
      %c0_41 = arith.constant 0 : index
      %73 = vector.load %arg15[%c0_40, %c0_41] : memref<16x128xbf16, #tpu.memory_space<vmem>>, vector<16x128xbf16>
      tpu.vector_store %arg15[%c0_40, %c0_41], %72 {strides = array<i32>} : memref<16x128xbf16, #tpu.memory_space<vmem>>, vector<16x128xbf16>,
      %cst_42 = arith.constant -1.000000e+30 : f32
      %74 = vector.broadcast %cst_42 : f32 to vector<16x1xf32>
      %c0_43 = arith.constant 0 : index
      %c0_44 = arith.constant 0 : index
      %75 = vector.load %arg13[%c0_43, %c0_44] : memref<16x1xf32, #tpu.memory_space<vmem>>, vector<16x1xf32>
      tpu.vector_store %arg13[%c0_43, %c0_44], %74 {strides = array<i32>} : memref<16x1xf32, #tpu.memory_space<vmem>>, vector<16x1xf32>,
      %cst_45 = arith.constant 0.000000e+00 : f32
      %76 = vector.broadcast %cst_45 : f32 to vector<16x1xf32>
      %c0_46 = arith.constant 0 : index
      %c0_47 = arith.constant 0 : index
      %77 = vector.load %arg14[%c0_46, %c0_47] : memref<16x1xf32, #tpu.memory_space<vmem>>, vector<16x1xf32>
      tpu.vector_store %arg14[%c0_46, %c0_47], %76 {strides = array<i32>} : memref<16x1xf32, #tpu.memory_space<vmem>>, vector<16x1xf32>,
    } else {
    }
    %c0 = arith.constant 0 : index
    %c0_1 = arith.constant 0 : index
    %3 = vector.load %arg15[%c0, %c0_1] : memref<16x128xbf16, #tpu.memory_space<vmem>>, vector<16x128xbf16>
    %c0_2 = arith.constant 0 : index
    %c0_3 = arith.constant 0 : index
    %4 = vector.load %arg8[%c0_2, %c0_3] : memref<128x256xbf16, #tpu.memory_space<vmem>>, vector<128x256xbf16>
    %cst = arith.constant dense<0.000000e+00> : vector<16x256xf32>
    %5 = tpu.matmul %3, %4, %cst {dimension_numbers = #tpu.dot_dimension_numbers<[1], [0], [0], [1], [0, 0, 1, 1], [], []>} : vector<16x128xbf16>, vector<128x256xbf16>, vector<16x256xf32> -> vector<16x256xf32>
    %c0_4 = arith.constant 0 : index
    %c0_5 = arith.constant 0 : index
    %6 = vector.load %arg9[%c0_4, %c0_5] : memref<1x256xf32, #tpu.memory_space<vmem>>, vector<1x256xf32>
    %7 = vector.broadcast %6 : vector<1x256xf32> to vector<16x256xf32>
    %8 = arith.addf %5, %7 : vector<16x256xf32>
    %9 = arith.truncf %8 : vector<16x256xf32> to vector<16x256xbf16>
    %c0_6 = arith.constant 0 : index
    %c0_7 = arith.constant 0 : index
    %10 = vector.load %arg10[%c0_6, %c0_7] : memref<16x256xbf16, #tpu.memory_space<vmem>>, vector<16x256xbf16>
    tpu.vector_store %arg10[%c0_6, %c0_7], %9 {strides = array<i32>} : memref<16x256xbf16, #tpu.memory_space<vmem>>, vector<16x256xbf16>,
    %c0_8 = arith.constant 0 : index
    %c0_9 = arith.constant 0 : index
    %11 = vector.load %arg13[%c0_8, %c0_9] : memref<16x1xf32, #tpu.memory_space<vmem>>, vector<16x1xf32>
    %cst_10 = arith.constant dense<0xFF800000> : vector<16xf32>
    %12 = vector.multi_reduction <maximumf>, %8, %cst_10 [1] : vector<16x256xf32> to vector<16xf32>
    %13 = vector.shape_cast %12 : vector<16xf32> to vector<16x1xf32>
    %14 = arith.maximumf %11, %13 : vector<16x1xf32>
    %c0_11 = arith.constant 0 : index
    %c0_12 = arith.constant 0 : index
    %15 = vector.load %arg14[%c0_11, %c0_12] : memref<16x1xf32, #tpu.memory_space<vmem>>, vector<16x1xf32>
    %16 = arith.subf %11, %14 : vector<16x1xf32>
    %17 = math.exp %16 : vector<16x1xf32>
    %18 = arith.mulf %15, %17 : vector<16x1xf32>
    %19 = vector.broadcast %14 : vector<16x1xf32> to vector<16x256xf32>
    %20 = arith.subf %8, %19 : vector<16x256xf32>
    %21 = math.exp %20 : vector<16x256xf32>
    %cst_13 = arith.constant dense<0.000000e+00> : vector<16xf32>
    %22 = vector.multi_reduction <add>, %21, %cst_13 [1] : vector<16x256xf32> to vector<16xf32>
    %23 = vector.shape_cast %22 : vector<16xf32> to vector<16x1xf32>
    %24 = arith.addf %18, %23 : vector<16x1xf32>
    %c0_14 = arith.constant 0 : index
    %c0_15 = arith.constant 0 : index
    %25 = vector.load %arg14[%c0_14, %c0_15] : memref<16x1xf32, #tpu.memory_space<vmem>>, vector<16x1xf32>
    tpu.vector_store %arg14[%c0_14, %c0_15], %24 {strides = array<i32>} : memref<16x1xf32, #tpu.memory_space<vmem>>, vector<16x1xf32>,
    %c0_16 = arith.constant 0 : index
    %c0_17 = arith.constant 0 : index
    %26 = vector.load %arg13[%c0_16, %c0_17] : memref<16x1xf32, #tpu.memory_space<vmem>>, vector<16x1xf32>
    tpu.vector_store %arg13[%c0_16, %c0_17], %14 {strides = array<i32>} : memref<16x1xf32, #tpu.memory_space<vmem>>, vector<16x1xf32>,
    %c0_i32_18 = arith.constant 0 : i32
    %27 = arith.cmpi eq, %arg1, %c0_i32_18 : i32
    %28 = arith.extui %27 : i1 to i32
    %c0_i32_19 = arith.constant 0 : i32
    %29 = arith.cmpi ne, %28, %c0_i32_19 : i32
    scf.if %29 {
      %c0_20 = arith.constant 0 : index
      %c0_21 = arith.constant 0 : index
      %30 = vector.load %arg13[%c0_20, %c0_21] : memref<16x1xf32, #tpu.memory_space<vmem>>, vector<16x1xf32>
      %c0_22 = arith.constant 0 : index
      %c0_23 = arith.constant 0 : index
      %31 = vector.load %arg14[%c0_22, %c0_23] : memref<16x1xf32, #tpu.memory_space<vmem>>, vector<16x1xf32>
      %32 = math.log %31 : vector<16x1xf32>
      %33 = arith.addf %30, %32 : vector<16x1xf32>
      %c0_24 = arith.constant 0 : index
      %c0_25 = arith.constant 0 : index
      %c0_26 = arith.constant 0 : index
      %34 = vector.load %arg11[%c0_24, %c0_25, %c0_26] : memref<1x16x1xf32, #tpu.memory_space<vmem>>, vector<1x16x1xf32>
      %35 = vector.shape_cast %34 : vector<1x16x1xf32> to vector<16x1xf32>
      %36 = vector.shape_cast %33 : vector<16x1xf32> to vector<1x16x1xf32>
      tpu.vector_store %arg11[%c0_24, %c0_25, %c0_26], %36 {strides = array<i32>} : memref<1x16x1xf32, #tpu.memory_space<vmem>>, vector<1x16x1xf32>,
    } else {
    }
    return
  }
  func.func @transform_0(%arg0: i32, %arg1: i32) -> (i32, i32) {
    %c0_i32 = arith.constant 0 : i32
    %c0_i32_0 = arith.constant 0 : i32
    %c0_i32_1 = arith.constant 0 : i32
    return %c0_i32, %c0_i32_0 : i32, i32
  }
  func.func @transform_1(%arg0: i32, %arg1: i32) -> (i32, i32) {
    %c0_i32 = arith.constant 0 : i32
    %c0_i32_0 = arith.constant 0 : i32
    %c0_i32_1 = arith.constant 0 : i32
    return %c0_i32, %c0_i32_0 : i32, i32
  }
  func.func @transform_2(%arg0: i32, %arg1: i32) -> (i32, i32) {
    %c0_i32 = arith.constant 0 : i32
    %c0_i32_0 = arith.constant 0 : i32
    %c0_i32_1 = arith.constant 0 : i32
    return %c0_i32, %c0_i32_0 : i32, i32
  }
  func.func @transform_3(%arg0: i32, %arg1: i32) -> (i32, i32) {
    %c0_i32 = arith.constant 0 : i32
    %c0_i32_0 = arith.constant 0 : i32
    %c0_i32_1 = arith.constant 0 : i32
    return %c0_i32, %c0_i32_0 : i32, i32
  }
  func.func @transform_4(%arg0: i32, %arg1: i32) -> (i32, i32) {
    %c0_i32 = arith.constant 0 : i32
    %c0_i32_0 = arith.constant 0 : i32
    %c0_i32_1 = arith.constant 0 : i32
    return %c0_i32, %c0_i32_0 : i32, i32
  }
  func.func @transform_5(%arg0: i32, %arg1: i32) -> (i32, i32) {
    %c0_i32 = arith.constant 0 : i32
    %c0_i32_0 = arith.constant 0 : i32
    %c0_i32_1 = arith.constant 0 : i32
    return %c0_i32, %c0_i32_0 : i32, i32
  }
  func.func @transform_6(%arg0: i32, %arg1: i32) -> (i32, i32) {
    %c1_i32 = arith.constant 1 : i32
    %0 = arith.muli %arg0, %c1_i32 : i32
    %1 = arith.addi %0, %arg1 : i32
    %c0_i32 = arith.constant 0 : i32
    %c0_i32_0 = arith.constant 0 : i32
    return %c0_i32, %1 : i32, i32
  }
  func.func @transform_7(%arg0: i32, %arg1: i32) -> (i32, i32) {
    %c1_i32 = arith.constant 1 : i32
    %0 = arith.muli %arg0, %c1_i32 : i32
    %1 = arith.addi %0, %arg1 : i32
    %c0_i32 = arith.constant 0 : i32
    %c0_i32_0 = arith.constant 0 : i32
    return %c0_i32, %1 : i32, i32
  }
  func.func @transform_8(%arg0: i32, %arg1: i32) -> (i32, i32) {
    %c1_i32 = arith.constant 1 : i32
    %0 = arith.muli %arg0, %c1_i32 : i32
    %1 = arith.addi %0, %arg1 : i32
    %c0_i32 = arith.constant 0 : i32
    %c0_i32_0 = arith.constant 0 : i32
    return %c0_i32, %1 : i32, i32
  }
  func.func @transform_9(%arg0: i32, %arg1: i32) -> (i32, i32, i32) {
    %c0_i32 = arith.constant 0 : i32
    %c0_i32_0 = arith.constant 0 : i32
    %c0_i32_1 = arith.constant 0 : i32
    return %arg0, %c0_i32, %c0_i32_0 : i32, i32, i32
  }
  func.func @transform_10(%arg0: i32, %arg1: i32) -> (i32, i32, i32) {
    %c0_i32 = arith.constant 0 : i32
    %c0_i32_0 = arith.constant 0 : i32
    %c0_i32_1 = arith.constant 0 : i32
    return %arg0, %c0_i32, %c0_i32_0 : i32, i32, i32
  }
}

module attributes {stable_mosaic.version = 11 : i64} {
  func.func @_decoder_step_kernel(%arg0: i32, %arg1: i32, %arg2: memref<16x128xbf16, #tpu.memory_space<vmem>>, %arg3: memref<16x128xf32, #tpu.memory_space<vmem>>, %arg4: memref<128x384xbf16, #tpu.memory_space<vmem>>, %arg5: memref<128x384xbf16, #tpu.memory_space<vmem>>, %arg6: memref<1x384xf32, #tpu.memory_space<vmem>>, %arg7: memref<1x384xf32, #tpu.memory_space<vmem>>, %arg8: memref<128x256xbf16, #tpu.memory_space<vmem>>, %arg9: memref<1x256xf32, #tpu.memory_space<vmem>>, %arg10: memref<16x256xbf16, #tpu.memory_space<vmem>>, %arg11: memref<1x16x1xf32, #tpu.memory_space<vmem>>, %arg12: memref<1x16x128xf32, #tpu.memory_space<vmem>>, %arg13: memref<16x1xf32, #tpu.memory_space<vmem>>, %arg14: memref<16x1xf32, #tpu.memory_space<vmem>>, %arg15: memref<16x128xbf16, #tpu.memory_space<vmem>>) attributes {dimension_semantics = [#tpu.dimension_semantics<parallel>, #tpu.dimension_semantics<arbitrary>], iteration_bounds = array<i64: 2, 1>, scalar_prefetch = 0 : i64, scratch_operands = 3 : i64, tpu.core_type = #tpu.core_type<tc>, window_params = [{pipeline_mode = #tpu.pipeline_mode<synchronous>, transform_indices = @transform_0, window_bounds = array<i64: 16, 128>}, {pipeline_mode = #tpu.pipeline_mode<synchronous>, transform_indices = @transform_1, window_bounds = array<i64: 16, 128>}, {pipeline_mode = #tpu.pipeline_mode<synchronous>, transform_indices = @transform_2, window_bounds = array<i64: 128, 384>}, {pipeline_mode = #tpu.pipeline_mode<synchronous>, transform_indices = @transform_3, window_bounds = array<i64: 128, 384>}, {pipeline_mode = #tpu.pipeline_mode<synchronous>, transform_indices = @transform_4, window_bounds = array<i64: 1, 384>}, {pipeline_mode = #tpu.pipeline_mode<synchronous>, transform_indices = @transform_5, window_bounds = array<i64: 1, 384>}, {transform_indices = @transform_6, window_bounds = array<i64: 128, 256>}, {transform_indices = @transform_7, window_bounds = array<i64: 1, 256>}, {transform_indices = @transform_8, window_bounds = array<i64: 16, 256>}, {transform_indices = @transform_9, window_bounds = array<i64: 1, 16, 1>}, {transform_indices = @transform_10, window_bounds = array<i64: 1, 16, 128>}]} {
    %c0_i32 = arith.constant 0 : i32
    %0 = arith.cmpi eq, %arg1, %c0_i32 : i32
    %1 = arith.extui %0 : i1 to i32
    %c0_i32_0 = arith.constant 0 : i32
    %2 = arith.cmpi ne, %1, %c0_i32_0 : i32
    scf.if %2 {
      %c0_20 = arith.constant 0 : index
      %c0_21 = arith.constant 0 : index
      %30 = vector.load %arg2[%c0_20, %c0_21] : memref<16x128xbf16, #tpu.memory_space<vmem>>, vector<16x128xbf16>
      %c0_22 = arith.constant 0 : index
      %c0_23 = arith.constant 0 : index
      %31 = vector.load %arg3[%c0_22, %c0_23] : memref<16x128xf32, #tpu.memory_space<vmem>>, vector<16x128xf32>
      %c0_24 = arith.constant 0 : index
      %c0_25 = arith.constant 0 : index
      %32 = vector.load %arg4[%c0_24, %c0_25] : memref<128x384xbf16, #tpu.memory_space<vmem>>, vector<128x384xbf16>
      %cst_26 = arith.constant dense<0.000000e+00> : vector<16x384xf32>
      %33 = tpu.matmul %30, %32, %cst_26 {dimension_numbers = #tpu.dot_dimension_numbers<[1], [0], [0], [1], [0, 0, 1, 1], [], []>} : vector<16x128xbf16>, vector<128x384xbf16>, vector<16x384xf32> -> vector<16x384xf32>
      %c0_27 = arith.constant 0 : index
      %c0_28 = arith.constant 0 : index
      %34 = vector.load %arg6[%c0_27, %c0_28] : memref<1x384xf32, #tpu.memory_space<vmem>>, vector<1x384xf32>
      %35 = vector.broadcast %34 : vector<1x384xf32> to vector<16x384xf32>
      %36 = arith.addf %33, %35 : vector<16x384xf32>
      %37 = arith.truncf %31 : vector<16x128xf32> to vector<16x128xbf16>
      %c0_29 = arith.constant 0 : index
      %c0_30 = arith.constant 0 : index
      %38 = vector.load %arg5[%c0_29, %c0_30] : memref<128x384xbf16, #tpu.memory_space<vmem>>, vector<128x384xbf16>
      %cst_31 = arith.constant dense<0.000000e+00> : vector<16x384xf32>
      %39 = tpu.matmul %37, %38, %cst_31 {dimension_numbers = #tpu.dot_dimension_numbers<[1], [0], [0], [1], [0, 0, 1, 1], [], []>} : vector<16x128xbf16>, vector<128x384xbf16>, vector<16x384xf32> -> vector<16x384xf32>
      %c0_32 = arith.constant 0 : index
      %c0_33 = arith.constant 0 : index
      %40 = vector.load %arg7[%c0_32, %c0_33] : memref<1x384xf32, #tpu.memory_space<vmem>>, vector<1x384xf32>
      %41 = vector.broadcast %40 : vector<1x384xf32> to vector<16x384xf32>
      %42 = arith.addf %39, %41 : vector<16x384xf32>
      %43 = vector.extract_strided_slice %36 {offsets = [0, 0], sizes = [16, 128], strides = [1, 1]} : vector<16x384xf32> to vector<16x128xf32>
      %44 = vector.extract_strided_slice %42 {offsets = [0, 0], sizes = [16, 128], strides = [1, 1]} : vector<16x384xf32> to vector<16x128xf32>
      %45 = arith.addf %43, %44 : vector<16x128xf32>
      %46 = arith.negf %45 : vector<16x128xf32>
      %47 = math.exp %46 : vector<16x128xf32>
      %cst_34 = arith.constant 1.000000e+00 : f32
      %48 = vector.broadcast %cst_34 : f32 to vector<16x128xf32>
      %49 = arith.addf %48, %47 : vector<16x128xf32>
      %50 = arith.divf %48, %49 : vector<16x128xf32>
      %51 = vector.extract_strided_slice %36 {offsets = [0, 128], sizes = [16, 128], strides = [1, 1]} : vector<16x384xf32> to vector<16x128xf32>
      %52 = vector.extract_strided_slice %42 {offsets = [0, 128], sizes = [16, 128], strides = [1, 1]} : vector<16x384xf32> to vector<16x128xf32>
      %53 = arith.addf %51, %52 : vector<16x128xf32>
      %54 = arith.negf %53 : vector<16x128xf32>
      %55 = math.exp %54 : vector<16x128xf32>
      %cst_35 = arith.constant 1.000000e+00 : f32
      %56 = vector.broadcast %cst_35 : f32 to vector<16x128xf32>
      %57 = arith.addf %56, %55 : vector<16x128xf32>
      %58 = arith.divf %56, %57 : vector<16x128xf32>
      %59 = vector.extract_strided_slice %36 {offsets = [0, 256], sizes = [16, 128], strides = [1, 1]} : vector<16x384xf32> to vector<16x128xf32>
      %60 = vector.extract_strided_slice %42 {offsets = [0, 256], sizes = [16, 128], strides = [1, 1]} : vector<16x384xf32> to vector<16x128xf32>
      %61 = arith.mulf %50, %60 : vector<16x128xf32>
      %62 = arith.addf %59, %61 : vector<16x128xf32>
      %63 = math.tanh %62 : vector<16x128xf32>
      %cst_36 = arith.constant 1.000000e+00 : f32
      %64 = vector.broadcast %cst_36 : f32 to vector<16x128xf32>
      %65 = arith.subf %64, %58 : vector<16x128xf32>
      %66 = arith.mulf %65, %63 : vector<16x128xf32>
      %67 = arith.mulf %58, %31 : vector<16x128xf32>
      %68 = arith.addf %66, %67 : vector<16x128xf32>
      %c0_37 = arith.constant 0 : index
      %c0_38 = arith.constant 0 : index
      %c0_39 = arith.constant 0 : index
      %69 = vector.load %arg12[%c0_37, %c0_38, %c0_39] : memref<1x16x128xf32, #tpu.memory_space<vmem>>, vector<1x16x128xf32>
      %70 = vector.shape_cast %69 : vector<1x16x128xf32> to vector<16x128xf32>
      %71 = vector.shape_cast %68 : vector<16x128xf32> to vector<1x16x128xf32>
      tpu.vector_store %arg12[%c0_37, %c0_38, %c0_39], %71 {strides = array<i32>} : memref<1x16x128xf32, #tpu.memory_space<vmem>>, vector<1x16x128xf32>,
      %72 = arith.truncf %68 : vector<16x128xf32> to vector<16x128xbf16>
      %c0_40 = arith.constant 0 : index
      %c0_41 = arith.constant 0 : index
      %73 = vector.load %arg15[%c0_40, %c0_41] : memref<16x128xbf16, #tpu.memory_space<vmem>>, vector<16x128xbf16>
      tpu.vector_store %arg15[%c0_40, %c0_41], %72 {strides = array<i32>} : memref<16x128xbf16, #tpu.memory_space<vmem>>, vector<16x128xbf16>,
      %cst_42 = arith.constant -1.000000e+30 : f32
      %74 = vector.broadcast %cst_42 : f32 to vector<16x1xf32>
      %c0_43 = arith.constant 0 : index
      %c0_44 = arith.constant 0 : index
      %75 = vector.load %arg13[%c0_43, %c0_44] : memref<16x1xf32, #tpu.memory_space<vmem>>, vector<16x1xf32>
      tpu.vector_store %arg13[%c0_43, %c0_44], %74 {strides = array<i32>} : memref<16x1xf32, #tpu.memory_space<vmem>>, vector<16x1xf32>,
      %cst_45 = arith.constant 0.000000e+00 : f32
      %76 = vector.broadcast %cst_45 : f32 to vector<16x1xf32>
      %c0_46 = arith.constant 0 : index
      %c0_47 = arith.constant 0 : index
      %77 = vector.load %arg14[%c0_46, %c0_47] : memref<16x1xf32, #tpu.memory_space<vmem>>, vector<16x1xf32>
      tpu.vector_store %arg14[%c0_46, %c0_47], %76 {strides = array<i32>} : memref<16x1xf32, #tpu.memory_space<vmem>>, vector<16x1xf32>,
    } else {
    }
    %c0 = arith.constant 0 : index
    %c0_1 = arith.constant 0 : index
    %3 = vector.load %arg15[%c0, %c0_1] : memref<16x128xbf16, #tpu.memory_space<vmem>>, vector<16x128xbf16>
    %c0_2 = arith.constant 0 : index
    %c0_3 = arith.constant 0 : index
    %4 = vector.load %arg8[%c0_2, %c0_3] : memref<128x256xbf16, #tpu.memory_space<vmem>>, vector<128x256xbf16>
    %cst = arith.constant dense<0.000000e+00> : vector<16x256xf32>
    %5 = tpu.matmul %3, %4, %cst {dimension_numbers = #tpu.dot_dimension_numbers<[1], [0], [0], [1], [0, 0, 1, 1], [], []>} : vector<16x128xbf16>, vector<128x256xbf16>, vector<16x256xf32> -> vector<16x256xf32>
    %c0_4 = arith.constant 0 : index
    %c0_5 = arith.constant 0 : index
    %6 = vector.load %arg9[%c0_4, %c0_5] : memref<1x256xf32, #tpu.memory_space<vmem>>, vector<1x256xf32>
    %7 = vector.broadcast %6 : vector<1x256xf32> to vector<16x256xf32>
    %8 = arith.addf %5, %7 : vector<16x256xf32>
    %9 = arith.truncf %8 : vector<16x256xf32> to vector<16x256xbf16>
    %c0_6 = arith.constant 0 : index
    %c0_7 = arith.constant 0 : index
    %10 = vector.load %arg10[%c0_6, %c0_7] : memref<16x256xbf16, #tpu.memory_space<vmem>>, vector<16x256xbf16>
    tpu.vector_store %arg10[%c0_6, %c0_7], %9 {strides = array<i32>} : memref<16x256xbf16, #tpu.memory_space<vmem>>, vector<16x256xbf16>,
    %c0_8 = arith.constant 0 : index
    %c0_9 = arith.constant 0 : index
    %11 = vector.load %arg13[%c0_8, %c0_9] : memref<16x1xf32, #tpu.memory_space<vmem>>, vector<16x1xf32>
    %cst_10 = arith.constant dense<0xFF800000> : vector<16xf32>
    %12 = vector.multi_reduction <maximumf>, %8, %cst_10 [1] : vector<16x256xf32> to vector<16xf32>
    %13 = vector.shape_cast %12 : vector<16xf32> to vector<16x1xf32>
    %14 = arith.maximumf %11, %13 : vector<16x1xf32>
    %c0_11 = arith.constant 0 : index
    %c0_12 = arith.constant 0 : index
    %15 = vector.load %arg14[%c0_11, %c0_12] : memref<16x1xf32, #tpu.memory_space<vmem>>, vector<16x1xf32>
    %16 = arith.subf %11, %14 : vector<16x1xf32>
    %17 = math.exp %16 : vector<16x1xf32>
    %18 = arith.mulf %15, %17 : vector<16x1xf32>
    %19 = vector.broadcast %14 : vector<16x1xf32> to vector<16x256xf32>
    %20 = arith.subf %8, %19 : vector<16x256xf32>
    %21 = math.exp %20 : vector<16x256xf32>
    %cst_13 = arith.constant dense<0.000000e+00> : vector<16xf32>
    %22 = vector.multi_reduction <add>, %21, %cst_13 [1] : vector<16x256xf32> to vector<16xf32>
    %23 = vector.shape_cast %22 : vector<16xf32> to vector<16x1xf32>
    %24 = arith.addf %18, %23 : vector<16x1xf32>
    %c0_14 = arith.constant 0 : index
    %c0_15 = arith.constant 0 : index
    %25 = vector.load %arg14[%c0_14, %c0_15] : memref<16x1xf32, #tpu.memory_space<vmem>>, vector<16x1xf32>
    tpu.vector_store %arg14[%c0_14, %c0_15], %24 {strides = array<i32>} : memref<16x1xf32, #tpu.memory_space<vmem>>, vector<16x1xf32>,
    %c0_16 = arith.constant 0 : index
    %c0_17 = arith.constant 0 : index
    %26 = vector.load %arg13[%c0_16, %c0_17] : memref<16x1xf32, #tpu.memory_space<vmem>>, vector<16x1xf32>
    tpu.vector_store %arg13[%c0_16, %c0_17], %14 {strides = array<i32>} : memref<16x1xf32, #tpu.memory_space<vmem>>, vector<16x1xf32>,
    %c0_i32_18 = arith.constant 0 : i32
    %27 = arith.cmpi eq, %arg1, %c0_i32_18 : i32
    %28 = arith.extui %27 : i1 to i32
    %c0_i32_19 = arith.constant 0 : i32
    %29 = arith.cmpi ne, %28, %c0_i32_19 : i32
    scf.if %29 {
      %c0_20 = arith.constant 0 : index
      %c0_21 = arith.constant 0 : index
      %30 = vector.load %arg13[%c0_20, %c0_21] : memref<16x1xf32, #tpu.memory_space<vmem>>, vector<16x1xf32>
      %c0_22 = arith.constant 0 : index
      %c0_23 = arith.constant 0 : index
      %31 = vector.load %arg14[%c0_22, %c0_23] : memref<16x1xf32, #tpu.memory_space<vmem>>, vector<16x1xf32>
      %32 = math.log %31 : vector<16x1xf32>
      %33 = arith.addf %30, %32 : vector<16x1xf32>
      %c0_24 = arith.constant 0 : index
      %c0_25 = arith.constant 0 : index
      %c0_26 = arith.constant 0 : index
      %34 = vector.load %arg11[%c0_24, %c0_25, %c0_26] : memref<1x16x1xf32, #tpu.memory_space<vmem>>, vector<1x16x1xf32>
      %35 = vector.shape_cast %34 : vector<1x16x1xf32> to vector<16x1xf32>
      %36 = vector.shape_cast %33 : vector<16x1xf32> to vector<1x16x1xf32>
      tpu.vector_store %arg11[%c0_24, %c0_25, %c0_26], %36 {strides = array<i32>} : memref<1x16x1xf32, #tpu.memory_space<vmem>>, vector<1x16x1xf32>,
    } else {
    }
    return
  }
  func.func @transform_0(%arg0: i32, %arg1: i32) -> (i32, i32) {
    %c0_i32 = arith.constant 0 : i32
    %c0_i32_0 = arith.constant 0 : i32
    %c0_i32_1 = arith.constant 0 : i32
    return %c0_i32, %c0_i32_0 : i32, i32
  }
  func.func @transform_1(%arg0: i32, %arg1: i32) -> (i32, i32) {
    %c0_i32 = arith.constant 0 : i32
    %c0_i32_0 = arith.constant 0 : i32
    %c0_i32_1 = arith.constant 0 : i32
    return %c0_i32, %c0_i32_0 : i32, i32
  }
  func.func @transform_2(%arg0: i32, %arg1: i32) -> (i32, i32) {
    %c0_i32 = arith.constant 0 : i32
    %c0_i32_0 = arith.constant 0 : i32
    %c0_i32_1 = arith.constant 0 : i32
    return %c0_i32, %c0_i32_0 : i32, i32
  }
  func.func @transform_3(%arg0: i32, %arg1: i32) -> (i32, i32) {
    %c0_i32 = arith.constant 0 : i32
    %c0_i32_0 = arith.constant 0 : i32
    %c0_i32_1 = arith.constant 0 : i32
    return %c0_i32, %c0_i32_0 : i32, i32
  }
  func.func @transform_4(%arg0: i32, %arg1: i32) -> (i32, i32) {
    %c0_i32 = arith.constant 0 : i32
    %c0_i32_0 = arith.constant 0 : i32
    %c0_i32_1 = arith.constant 0 : i32
    return %c0_i32, %c0_i32_0 : i32, i32
  }
  func.func @transform_5(%arg0: i32, %arg1: i32) -> (i32, i32) {
    %c0_i32 = arith.constant 0 : i32
    %c0_i32_0 = arith.constant 0 : i32
    %c0_i32_1 = arith.constant 0 : i32
    return %c0_i32, %c0_i32_0 : i32, i32
  }
  func.func @transform_6(%arg0: i32, %arg1: i32) -> (i32, i32) {
    %c1_i32 = arith.constant 1 : i32
    %0 = arith.muli %arg0, %c1_i32 : i32
    %1 = arith.addi %0, %arg1 : i32
    %c0_i32 = arith.constant 0 : i32
    %c0_i32_0 = arith.constant 0 : i32
    return %c0_i32, %1 : i32, i32
  }
  func.func @transform_7(%arg0: i32, %arg1: i32) -> (i32, i32) {
    %c1_i32 = arith.constant 1 : i32
    %0 = arith.muli %arg0, %c1_i32 : i32
    %1 = arith.addi %0, %arg1 : i32
    %c0_i32 = arith.constant 0 : i32
    %c0_i32_0 = arith.constant 0 : i32
    return %c0_i32, %1 : i32, i32
  }
  func.func @transform_8(%arg0: i32, %arg1: i32) -> (i32, i32) {
    %c1_i32 = arith.constant 1 : i32
    %0 = arith.muli %arg0, %c1_i32 : i32
    %1 = arith.addi %0, %arg1 : i32
    %c0_i32 = arith.constant 0 : i32
    %c0_i32_0 = arith.constant 0 : i32
    return %c0_i32, %1 : i32, i32
  }
  func.func @transform_9(%arg0: i32, %arg1: i32) -> (i32, i32, i32) {
    %c0_i32 = arith.constant 0 : i32
    %c0_i32_0 = arith.constant 0 : i32
    %c0_i32_1 = arith.constant 0 : i32
    return %arg0, %c0_i32, %c0_i32_0 : i32, i32, i32
  }
  func.func @transform_10(%arg0: i32, %arg1: i32) -> (i32, i32, i32) {
    %c0_i32 = arith.constant 0 : i32
    %c0_i32_0 = arith.constant 0 : i32
    %c0_i32_1 = arith.constant 0 : i32
    return %arg0, %c0_i32, %c0_i32_0 : i32, i32, i32
  }
}

</mosaic_0001>

<bundles_post_ra>
// kernel: tpu_custom_call.1
= control target key start
LH: loop header
LB: loop body
LE: loop exit
PB: predicated region body
PF: predicated region fallthrough
CT: control target
= control target key end

     0   :  { %s2791_s0 = inlined_call_operand.hbm [shape: bf16[16,128], index: 0, kind: input, shape index: {}]   ;;  %s2792_s1 = inlined_call_operand.hbm [shape: f32[16,128], index: 1, kind: input, shape index: {}]   ;;  %s2793_s2 = inlined_call_operand.hbm [shape: bf16[128,384], index: 2, kind: input, shape index: {}]   ;;  %s2794_s3 = inlined_call_operand.hbm [shape: bf16[128,384], index: 3, kind: input, shape index: {}]   ;;  %s2795_s4 = inlined_call_operand.vmem [shape: f32[1,384], index: 4, kind: input, shape index: {}]   ;;  %s2796_s5 = inlined_call_operand.hbm [shape: f32[1,384], index: 5, kind: input, shape index: {}]   ;;  %s2797_s6 = inlined_call_operand.hbm [shape: bf16[128,512], index: 6, kind: input, shape index: {}]   ;;  %s2798_s7 = inlined_call_operand.vmem [shape: f32[1,512], index: 7, kind: input, shape index: {}]   ;;  %s2799_s8 = inlined_call_operand.hbm [shape: bf16[16,512], index: 8, kind: output, shape index: {0}]   ;;  %s2800_s9 = inlined_call_operand.vmem [shape: f32[2,16,1], index: 9, kind: output, shape index: {1}]   ;;  %s2801_s10 = inlined_call_operand.hbm [shape: f32[2,16,128], index: 10, kind: output, shape index: {2}]  }
   0x1   :  { %2809 = sst [smem:[#allocation27_spill]] %s2791_s0 }
   0x2   :  { %2810 = sst [smem:[#allocation28_spill]] %s2792_s1 }
   0x3   :  { %2811 = sst [smem:[#allocation29_spill]] %s2793_s2 }
   0x4   :  { %2812 = sst [smem:[#allocation30_spill]] %s2794_s3 }
   0x5   :  { %16 = vsyncpa [#allocation6], 0 }
   0x6   :  { %17 = vsyncpa [#allocation9], 0 }
   0x7   :  { %18 = vsyncpa [#allocation12], 0 }
   0x8   :  { %19 = vsyncpa [#allocation15], 0 }
   0x9   :  { %21 = vsyncpa [#allocation15 + $0x1], 0 }
   0xa   :  { %22 = vsyncpa [#allocation7], 0 }
   0xb   :  { %24 = vsyncpa [#allocation7 + $0x1], 0 }
   0xc   :  { %25 = vsyncpa [#allocation18], 0 }
   0xd   :  { %27 = vsyncpa [#allocation18 + $0x1], 0  ;;  %s2398_s13 = smov 0   ;;  %s2400_s14 = smov 0  }
   0xe   :  { %s2402_s15 = smov 0   ;;  %s2404_s16 = smov 0  }
   0xf   :  { %s2406_s17 = smov 0   ;;  %s2408_s18 = smov 0  }
  0x10 LB: > { %2813 = sst [smem:[#allocation25_spill]] %s2299_s13  ;;  %s1602_s19 = sadd.s32 4294967295, %s2319_s18   ;;  %s2319_s18 = sphi %s2408_s18, %s33_s18   ;;  %s2315_s17 = sphi %s2406_s17, %s2841_s17   ;;  %s2311_s16 = sphi %s2404_s16, %s2840_s16   ;;  %s2307_s15 = sphi %s2402_s15, %s2839_s15   ;;  %s2303_s14 = sphi %s2400_s14, %s2838_s14   ;;  %s2299_s13 = sphi %s2398_s13, %s2837_s13  }
  0x11   : > { %s1603_s20 = sadd.s32 4294967294, %s2319_s18   ;;  %p193_p0 = scmp.ne.s32.totalorder %s2303_s14, %s2299_s13 }
  0x12   : > { %p2432_p1 = scmp.eq.s32.totalorder %s1602_s19, 0  ;;  %p2436_p2 = scmp.eq.s32.totalorder %s1602_s19, 1 }
  0x13   : > { %p253_p3 = scmp.eq.s32.totalorder %s1603_s20, 1  ;;  %p1604_p5 = scmp.ge.s32.totalorder %s2319_s18, 1 }
  0x14   : > { %p2442_p4 = por %p2432_p1, %p193_p0  ;;  %p312_p7 = scmp.lt.s32.totalorder %s2319_s18, 3 }
  0x15   : > { %p2447_p6 = por %p253_p3, %p193_p0  ;;  %s2321_s26 = smov [#allocation8]  }
  0x16   : > { %p2452_p8 = pnand %p1604_p5, %p312_p7  ;;  %s337_s27 = sshll.u32 %s2321_s26, 4  ;;  %s338_s27 = int_to_ptr.vmem [resolvable:$true] %s337_s27 }
  0x17   : > { %s2817_s24 = scalar_select %p2447_p6, 1, 0 }
  0x18   : > { %p1805_p9 = pneg %p2452_p8  ;;  %s2322_s29 = smov [#allocation11]  }
  0x19   : > { %2818 = sst [smem:[#allocation26_spill]] %s2817_s24  ;;  %s363_s30 = sshll.u32 %s2322_s29, 4  ;;  %s364_s30 = int_to_ptr.vmem [resolvable:$true] %s363_s30 }
  0x1a   : > { %p2461_p11 = pnand %p1805_p9, %p2432_p1  ;;  %s2050_s12 = scalar_lea.vmem %s338_s27, 256 }
  0x1b   : > { %p2051_p13 = scmp.ne.s32.totalorder %s338_s27, %s2050_s12  ;;  %p2058_p5 = scmp.lt.s32.totalorder %s338_s27, %s338_s27 }
  0x1c   : > { %p2467_p12 = pneg %p2461_p11  ;;  %p2059_p7 = scmp.lt.s32.totalorder %s2050_s12, %s2050_s12 }
  0x1e   : > { %p2053_p0 = pnand %p2051_p13, %p2467_p12  ;;  %p2060_p9 = por %p2059_p7, %p2058_p5 }
  0x20   : > { %p2054_p3 = pneg %p2053_p0 }
  0x22   : > { %p2061_p10 = pnand %p2060_p9, %p2054_p3 }
  0x24   : > { %2064 = shalt.err (!%p2061_p10)
}
  0x25   : > { %s2804_s19 = smov 128   ;;  %s2805_s20 = smov 8  }
  0x26   : > { %s2822_s1 = sld [smem:[#allocation28_spill]]  ;;  %s2076_s24 = scalar_lea.vmem %s364_s30, 3072 }
  0x27   : > { %p2077_p13 = scmp.ne.s32.totalorder %s364_s30, %s2076_s24  ;;  %p2084_p3 = scmp.lt.s32.totalorder %s364_s30, %s364_s30 }
  0x28   : > { %p2085_p10 = scmp.lt.s32.totalorder %s2076_s24, %s2076_s24 }
  0x29   : > { %p2079_p0 = pnand %p2077_p13, %p2467_p12 }
  0x2a   : > { %p2086_p7 = por %p2085_p10, %p2084_p3 }
  0x2b   : > { %p2080_p5 = pneg %p2079_p0 }
  0x2c   : > { %1811 = dma.hbm_to_vmem [thread:$0]  (!%p2461_p11), %s2822_s1, 256, %s338_s27, [#allocation9], %s2804_s19, %s2804_s19, %s2805_s20  }
  0x2d   : > { %p2087_p9 = pnand %p2086_p7, %p2080_p5 }
  0x2f   : > { %2090 = shalt.err (!%p2087_p9)
}
  0x30   : > { %s2806_s12 = smov 192   ;;  %s2807_s13 = smov 12  }
  0x31   : > { %s2823_s3 = sld [smem:[#allocation30_spill]]  ;;  %s2327_s29 = smov [#allocation5]  }
  0x32   : > { %s324_s19 = sshll.u32 %s2327_s29, 4  ;;  %s325_s19 = int_to_ptr.vmem [resolvable:$true] %s324_s19 }
  0x33   : > { %s2102_s20 = scalar_lea.vmem %s325_s19, 128  ;;  %p2110_p3 = scmp.lt.s32.totalorder %s325_s19, %s325_s19 }
  0x34   : > { %p2103_p13 = scmp.ne.s32.totalorder %s325_s19, %s2102_s20  ;;  %p2111_p10 = scmp.lt.s32.totalorder %s2102_s20, %s2102_s20 }
  0x36   : > { %p2105_p0 = pnand %p2103_p13, %p2467_p12  ;;  %p2112_p7 = por %p2111_p10, %p2110_p3 }
  0x37   : > { %1817 = dma.hbm_to_vmem [thread:$0]  (!%p2461_p11), %s2823_s3, 3072, %s364_s30, [#allocation12], %s2806_s12, %s2806_s12, %s2807_s13  }
  0x38   : > { %p2106_p5 = pneg %p2105_p0 }
  0x3a   : > { %p2113_p9 = pnand %p2112_p7, %p2106_p5 }
  0x3c   : > { %2116 = shalt.err (!%p2113_p9)
}
  0x3d   : > { %s2328_s24 = smov 64   ;;  %s2329_s1 = smov 4  }
  0x3e   : > { %s2824_s0 = sld [smem:[#allocation27_spill]]  ;;  %s2330_s26 = smov [#allocation10]  }
  0x3f   : > { %s350_s29 = sshll.u32 %s2330_s26, 4  ;;  %s2331_s12 = smov [#allocation13]   ;;  %s351_s29 = int_to_ptr.vmem [resolvable:$true] %s350_s29 }
  0x40   : > { %s380_s13 = sshll.u32 %s2331_s12, 4  ;;  %s2128_s3 = scalar_lea.vmem %s351_s29, 3072  ;;  %s381_s13 = int_to_ptr.vmem [resolvable:$true] %s380_s13 }
  0x41   : > { %p2129_p13 = scmp.ne.s32.totalorder %s351_s29, %s2128_s3  ;;  %p2136_p3 = scmp.lt.s32.totalorder %s351_s29, %s351_s29 }
  0x42   : > { %p2137_p10 = scmp.lt.s32.totalorder %s2128_s3, %s2128_s3 }
  0x43   : > { %p2131_p0 = pnand %p2129_p13, %p2467_p12 }
  0x44   : > { %1808 = dma.hbm_to_vmem [thread:$0]  (!%p2461_p11), %s2824_s0, 128, %s325_s19, [#allocation6], %s2328_s24, %s2328_s24, %s2329_s1  }
  0x45   : > { %p2132_p5 = pneg %p2131_p0  ;;  %p2138_p7 = por %p2137_p10, %p2136_p3 }
  0x47   : > { %p2139_p9 = pnand %p2138_p7, %p2132_p5 }
  0x49   : > { %2142 = shalt.err (!%p2139_p9)
}
  0x4a   : > { %s2825_s20 = smov 12   ;;  %s2826_s27 = smov 192  }
  0x4b   : > { %s2827_s2 = sld [smem:[#allocation29_spill]]  ;;  %s2154_s12 = scalar_lea.vmem %s381_s13, 48 }
  0x4c   : > { %p2155_p6 = scmp.ne.s32.totalorder %s381_s13, %s2154_s12  ;;  %s2161_s3 = scalar_lea.vmem %s381_s13, 64 }
  0x4d   : > { %p2162_p3 = scmp.lt.s32.totalorder %s381_s13, %s381_s13  ;;  %p2163_p5 = scmp.lt.s32.totalorder %s2161_s3, %s2154_s12 }
  0x4e   : > { %p2157_p13 = pnand %p2155_p6, %p2467_p12 }
  0x4f   : > { %p2164_p10 = por %p2163_p5, %p2162_p3 }
  0x50   : > { %p2158_p0 = pneg %p2157_p13 }
  0x51   : > { %1814 = dma.hbm_to_vmem [thread:$0]  (!%p2461_p11), %s2827_s2, 3072, %s351_s29, [#allocation9], %s2826_s27, %s2826_s27, %s2825_s20  }
  0x52   : > { %p2165_p7 = pnand %p2164_p10, %p2158_p0 }
  0x54   : > { %2168 = shalt.err (!%p2165_p7)
}
  0x55   : > { %1820 = dma.hbm_to_vmem [thread:$0]  (!%p2461_p11), %s2796_s5, 48, %s381_s13, [#allocation12]  }
  0x56   : > { %s180_s11 = sadd.s32 1, %s2307_s15  ;;  %s45_s26 = sadd.s32 1, %s2315_s17 }
  0x57   : > { %p187_p6 = scmp.ne.s32.totalorder %s2307_s15, %s2303_s14  ;;  %p47_p12 = scmp.ge.s32.totalorder %s45_s26, 2 }
  0x58   : > { %p188_p9 = scmp.eq.s32.totalorder %s2319_s18, 0  ;;  %p1837_p0 = scmp.lt.s32.totalorder %s2319_s18, 2 }
  0x59   : > { %p2522_p13 = por %p2436_p2, %p187_p6  ;;  %s2843_s26 = smov (%p47_p12, %s45_s26), 0 }
  0x5a   : > { %p189_p3 = por %p188_p9, %p187_p6  ;;  %s391_s29 = sand.u32 1, %s2307_s15  }
  0x5b   : > { %s2828_s28 = scalar_select %p2522_p13, 1, 0 }
  0x5c   : > { %s177_s20 = ssub.s32 %s2315_s17, %s2843_s26  ;;  %s1611_s13 = sshll.u32 %s391_s29, 7 }
  0x5d   : > { %p178_p5 = scmp.eq.s32.totalorder %s177_s20, 0  ;;  %s1708_s27 = sshll.u32 %s2315_s17, 7 }
  0x5e   : > { %s402_s22 = scalar_lea.hbm %s2797_s6, %s1708_s27  ;;  %s395_s3 = scalar_lea.vmem [#allocation14], %s1611_s13 }
  0x5f   : > { %s2534_s1 = scalar_select %p178_p5, %s2307_s15, %s180_s11  }
  0x60   : > { %s403_s24 = sshll.u32 %s395_s3, 4  ;;  %p2541_p2 = pnand %p1837_p0, %p189_p3  ;;  %s404_s24 = int_to_ptr.vmem [resolvable:$true] %s403_s24 }
  0x61   : > { %s392_s0 = scalar_lea.sflag [#allocation15], %s391_s29  ;;  %s2182_s20 = scalar_lea.vmem %s404_s24, 2048 }
  0x62   : > { %p2171_p11 = pneg %p2541_p2  ;;  %p2183_p10 = scmp.ne.s32.totalorder %s404_s24, %s2182_s20 }
  0x63   : > { %s2332_s11 = smov [#allocation14]  }
  0x64   : > { %p2185_p7 = pnand %p2183_p10, %p2171_p11  ;;  %s2187_s2 = sshll.u32 %s2332_s11, 4  ;;  %s2188_s2 = int_to_ptr.vmem [resolvable:$false] %s2187_s2 }
  0x65   : > { %s2189_s27 = scalar_lea.vmem %s2188_s2, 4096  ;;  %p2190_p12 = scmp.lt.s32.totalorder %s404_s24, %s2188_s2 }
  0x66   : > { %p2186_p6 = pneg %p2185_p7  ;;  %p2191_p9 = scmp.lt.s32.totalorder %s2189_s27, %s2182_s20 }
  0x68   : > { %p2192_p5 = por %p2191_p9, %p2190_p12 }
  0x6a   : > { %p2193_p13 = pnand %p2192_p5, %p2186_p6 }
  0x6c   : > { %2196 = shalt.err (!%p2193_p13)
}
  0x6d   : > { %s2333_s13 = smov 256   ;;  %s2830_s19 = smov 8  }
  0x6e   : > { %s2831_s29 = smov 128   ;;  %425 = sbr.rel (%p2452_p8) target bundleno = 1111 (0x457), region = 52 }
  0x6f   : > { %1824 = dma.hbm_to_vmem [thread:$0]  (!%p2541_p2), %s402_s22, 2048, %s404_s24, %s392_s0, %s2333_s13, %s2831_s29, %s2830_s19  }
  0x73   : > { %2274 = dma.done.wait (%p2432_p1), [#allocation6], 128  }
  0x74   : > { %2276 = vsyncadd (%p2432_p1), [#allocation6], 4294967168 }
  0x75   : > { %2278 = dma.done.wait (%p2432_p1), [#allocation9], 3328  }
  0x76   : > { %2280 = vsyncadd (%p2432_p1), [#allocation9], 4294963968 }
  0x77   : > { %2282 = dma.done.wait (%p2432_p1), [#allocation12], 3120  }
  0x78   : > { %2284 = vsyncadd (%p2432_p1), [#allocation12], 4294964176  ;;  %s2566_s0 = sand.u32 1, %s2303_s14  }
  0x79   : > { %s1620_s2 = sshll.u32 %s2566_s0, 7  ;;  %s448_s25 = scalar_lea.sflag [#allocation15], %s2566_s0 }
  0x7a   : > { %s2570_s12 = scalar_lea.vmem [#allocation14], %s1620_s2 }
  0x7b   : > { %2286 = dma.done.wait (%p2442_p4), %s448_s25, 2048  }
  0x7c   : > { %2288 = vsyncadd (%p2442_p4), %s448_s25, 4294965248  ;;  %v2334_v0 = vmov 0.0   ;;  %v2335_v1 = vmov 0   ;;  %vm2336_vm0 = vmmov 0   ;;  %v1913_v2 = vld [vmem:[#allocation10 + $0xac] ss:$12 sps:$4 sm:$0xff]  }
  0x7d   : > { %1739 = vmatprep.subr.bf16.mxu1 %v2334_v0  ;;  %743 = vmatprep.mubr.bf16.mxu0 %v2335_v1  ;;  %v1915_v3 = vld [vmem:[#allocation10 + $0xa8] ss:$12 sps:$4 sm:$0xff]   ;;  %v1918_v5 = vld [vmem:[#allocation10 + $0x90] ss:$12 sps:$4 sm:$0xff]   ;;  %v1921_v7 = vld [vmem:[#allocation10 + $0x78] ss:$12 sps:$4 sm:$0xff]  }
  0x7e   : > { %1755 = vmatprep.mubr.msk.bf16.mxu1 %vm2336_vm0, %v2334_v0  ;;  %1911 = vset.pattern.permute.xlu1 %v2335_v1  ;;  %v1916_v4 = vld [vmem:[#allocation10 + $0x94] ss:$12 sps:$4 sm:$0xff]   ;;  %v1919_v6 = vld [vmem:[#allocation10 + $0x7c] ss:$12 sps:$4 sm:$0xff]   ;;  %v1922_v8 = vld [vmem:[#allocation10 + $0x64] ss:$12 sps:$4 sm:$0xff]  }
  0x7f   : > { %1912 = vset.pattern.permute.xlu0 %v2335_v1  ;;  %711 = vmatprep.subr.bf16.mxu0 %v1913_v2  ;;  %v1924_v9 = vld [vmem:[#allocation10 + $0x60] ss:$12 sps:$4 sm:$0xff]   ;;  %v1937_v10 = vld [vmem:[#allocation10 + $0xb0] ss:$12 sps:$4 sm:$0xff]   ;;  %v1942_v12 = vld [vmem:[#allocation10 + $0x98] ss:$12 sps:$4 sm:$0xff]  }
  0x80   : > { %712 = vmatpush1.bf16.msra.mxu0 %v1915_v3  ;;  %v1925_v11 = vld [vmem:[#allocation10 + $0x4c] ss:$12 sps:$4 sm:$0xff]   ;;  %1740 = vmatpush3.bf16.msra.mxu1 %v1937_v10  ;;  %v1927_v13 = vld [vmem:[#allocation10 + $0x48] ss:$12 sps:$4 sm:$0xff]   ;;  %v1930_v16 = vld [vmem:[#allocation10 + $0x30] ss:$12 sps:$4 sm:$0xff]  }
  0x81   : > { %713 = vmatprep.subr.bf16.mxu0 %v1916_v4  ;;  %1741 = vmatprep.subr.bf16.mxu1 %v2334_v0  ;;  %v1928_v14 = vld [vmem:[#allocation10 + $0x34] ss:$12 sps:$4 sm:$0xff]   ;;  %v1931_v17 = vld [vmem:[#allocation10 + $0x1c] ss:$12 sps:$4 sm:$0xff]   ;;  %v1933_v19 = vld [vmem:[#allocation10 + $0x18] ss:$12 sps:$4 sm:$0xff]  }
  0x82   : > { %v1946_v15 = vld [vmem:[#allocation10 + $0x80] ss:$12 sps:$4 sm:$0xff]   ;;  %v1950_v18 = vld [vmem:[#allocation10 + $0x68] ss:$12 sps:$4 sm:$0xff]   ;;  %v1934_v20 = vld [vmem:[#allocation10 + $0x4] ss:$12 sps:$4 sm:$0xff]  }
  0x83   : > { %v1954_v21 = vld [vmem:[#allocation10 + $0x50] ss:$12 sps:$4 sm:$0xff]   ;;  %v1936_v22 = vld [vmem:[#allocation10] ss:$12 sps:$4 sm:$0xff]   ;;  %v1958_v24 = vld [vmem:[#allocation10 + $0x38] ss:$12 sps:$4 sm:$0xff]  }
  0x84   : > { %714 = vmatpush1.bf16.msra.mxu0 %v1918_v5  ;;  %1742 = vmatpush3.bf16.msra.mxu1 %v1942_v12  ;;  %v1941_v23 = vld [vmem:[#allocation11 + $0xac] ss:$12 sps:$4 sm:$0xff]   ;;  %v1939_v26 = vld [vmem:[#allocation11 + $0xa8] ss:$12 sps:$4 sm:$0xff]   ;;  %v1943_v29 = vld [vmem:[#allocation11 + $0x90] ss:$12 sps:$4 sm:$0xff]  }
  0x85   : > { %715 = vmatprep.subr.bf16.mxu0 %v1919_v6  ;;  %1743 = vmatprep.subr.bf16.mxu1 %v2334_v0  ;;  %v1938_v25 = vld [vmem:[#allocation5] sm:$0xff]   ;;  %v1945_v27 = vld [vmem:[#allocation11 + $0x94] ss:$12 sps:$4 sm:$0xff]   ;;  %v1947_v31 = vld [vmem:[#allocation11 + $0x78] ss:$12 sps:$4 sm:$0xff]   ;;  %s1621_s22 = sshll.u32 %s2566_s0, 4 }
  0x86   : > { %v1962_v28 = vld [vmem:[#allocation10 + $0x20] ss:$12 sps:$4 sm:$0xff]   ;;  %v1949_v30 = vld [vmem:[#allocation11 + $0x7c] ss:$12 sps:$4 sm:$0xff]   ;;  %v1953_v33 = vld [vmem:[#allocation11 + $0x64] ss:$12 sps:$4 sm:$0xff]  }
  0x87   : > { %v1966_v32 = vld [vmem:[#allocation10 + $0x8] ss:$12 sps:$4 sm:$0xff]   ;;  %v1970_v34 = vld [vmem:[#allocation11 + $0xb0] ss:$12 sps:$4 sm:$0xff]   ;;  %v1951_v35 = vld [vmem:[#allocation11 + $0x60] ss:$12 sps:$4 sm:$0xff]  }
  0x88   : > { %716 = vmatpush1.bf16.msra.mxu0 %v1921_v7  ;;  %1744 = vmatpush3.bf16.msra.mxu1 %v1946_v15  ;;  %v1957_v36 = vld [vmem:[#allocation11 + $0x4c] ss:$12 sps:$4 sm:$0xff]   ;;  %v1955_v38 = vld [vmem:[#allocation11 + $0x48] ss:$12 sps:$4 sm:$0xff]   ;;  %v1959_v41 = vld [vmem:[#allocation11 + $0x30] ss:$12 sps:$4 sm:$0xff]  }
  0x89   : > { %717 = vmatprep.subr.bf16.mxu0 %v1922_v8  ;;  %1745 = vmatprep.subr.bf16.mxu1 %v2334_v0  ;;  %v1971_v37 = vld [vmem:[#allocation11 + $0x98] ss:$12 sps:$4 sm:$0xff]   ;;  %v1961_v39 = vld [vmem:[#allocation11 + $0x34] ss:$12 sps:$4 sm:$0xff]   ;;  %v1965_v42 = vld [vmem:[#allocation11 + $0x1c] ss:$12 sps:$4 sm:$0xff]  }
  0x8a   : > { %v1972_v40 = vld [vmem:[#allocation11 + $0x80] ss:$12 sps:$4 sm:$0xff]   ;;  %v1973_v43 = vld [vmem:[#allocation11 + $0x68] ss:$12 sps:$4 sm:$0xff]   ;;  %v1963_v44 = vld [vmem:[#allocation11 + $0x18] ss:$12 sps:$4 sm:$0xff]  }
  0x8b   : > { %v1969_v45 = vld [vmem:[#allocation11 + $0x4] ss:$12 sps:$4 sm:$0xff]   ;;  %v1967_v47 = vld [vmem:[#allocation11] ss:$12 sps:$4 sm:$0xff]   ;;  %v2599_v49 = vld [vmem:[#allocation8 + $0x8] sm:$0xff]  ;;  %s2642_s3 = scalar_lea.vmem [#allocation17], %s1621_s22 }
  0x8c   : > { %718 = vmatpush1.bf16.msra.mxu0 %v1924_v9  ;;  %1746 = vmatpush3.bf16.msra.mxu1 %v1950_v18  ;;  %v1974_v46 = vld [vmem:[#allocation11 + $0x50] ss:$12 sps:$4 sm:$0xff]   ;;  %v1975_v50 = vld [vmem:[#allocation11 + $0x38] ss:$12 sps:$4 sm:$0xff]   ;;  %v1976_v52 = vld [vmem:[#allocation11 + $0x20] ss:$12 sps:$4 sm:$0xff]  }
  0x8d   : > { %719 = vmatprep.subr.bf16.mxu0 %v1925_v11  ;;  %1747 = vmatprep.subr.bf16.mxu1 %v2334_v0  ;;  %v2597_v48 = vld [vmem:[#allocation8] sm:$0xff]  ;;  %v1980_v54 = vld [vmem:[%s2570_s12 + $0x74] ss:$8 sps:$4 sm:$0xff]   ;;  %v1981_v57 = vld [vmem:[%s2570_s12 + $0x60] ss:$8 sps:$4 sm:$0xff]   ;;  %v562_v11 = vlaneseq  ;;  %vm1111_vm1 = vcmask 7168  }
  0x8e   : > { %v795_v51 = vpack.c.bf16 %v2599_v49, %v2597_v48  ;;  %v1977_v53 = vld [vmem:[#allocation11 + $0x8] ss:$12 sps:$4 sm:$0xff]   ;;  %v1986_v58 = vld [vmem:[%s2570_s12 + $0x54] ss:$8 sps:$4 sm:$0xff]   ;;  %v1987_v61 = vld [vmem:[%s2570_s12 + $0x40] ss:$8 sps:$4 sm:$0xff]  }
  0x8f   : > { %v1978_v55 = vld [vmem:[%s2570_s12 + $0x70] ss:$8 sps:$4 sm:$0xff]   ;;  %v1983_v56 = vld [vmem:[%s2570_s12 + $0x64] ss:$8 sps:$4 sm:$0xff]   ;;  %v1992_v62 = vld [vmem:[%s2570_s12 + $0x34] ss:$8 sps:$4 sm:$0xff]  }
  0x90   : > { %720 = vmatpush1.bf16.msra.mxu0 %v1927_v13  ;;  %1748 = vmatpush3.bf16.msra.mxu1 %v1954_v21  ;;  %v1984_v59 = vld [vmem:[%s2570_s12 + $0x50] ss:$8 sps:$4 sm:$0xff]   ;;  %v1989_v60 = vld [vmem:[%s2570_s12 + $0x44] ss:$8 sps:$4 sm:$0xff]   ;;  %v1993_v2 = vld [vmem:[%s2570_s12 + $0x20] ss:$8 sps:$4 sm:$0xff]  }
  0x91   : > { %721 = vmatprep.subr.bf16.mxu0 %v1928_v14  ;;  %1749 = vmatprep.subr.bf16.mxu1 %v2334_v0  ;;  %v1990_v63 = vld [vmem:[%s2570_s12 + $0x30] ss:$8 sps:$4 sm:$0xff]   ;;  %v1998_v3 = vld [vmem:[%s2570_s12 + $0x14] ss:$8 sps:$4 sm:$0xff]   ;;  %v2001_v5 = vld [vmem:[%s2570_s12 + $0x4] ss:$8 sps:$4 sm:$0xff]  }
  0x92   : > { %v1996_v4 = vld [vmem:[%s2570_s12 + $0x10] ss:$8 sps:$4 sm:$0xff]   ;;  %v1999_v6 = vld [vmem:[%s2570_s12] ss:$8 sps:$4 sm:$0xff]   ;;  %v563_v13 = vshrl.u32 %v562_v11, 7  ;;  %1114 = vst.msk [vmem:[#allocation3] sm:$0xff] %vm1111_vm1, %v2334_v0 }
  0x93   : > { %v828_v18 = vld [vmem:[#allocation13] sm:$0x7]  ;;  %1115 = vst.msk [vmem:[#allocation3 + $0x8] sm:$0xff] %vm1111_vm1, %v2334_v0  ;;  %s1623_s24 = sshll.u32 %s2311_s16, 1  ;;  %s2660_s27 = scalar_lea.vmem [#allocation16], %s1621_s22 }
  0x94   : > { %722 = vmatpush1.bf16.msra.mxu0 %v1930_v16  ;;  %1750 = vmatpush3.bf16.msra.mxu1 %v1958_v24  ;;  %v2625_v15 = vsub.s32 0, %v563_v13  ;;  %v560_v16 = vld [vmem:[%s2795_s4] sm:$0x7]  ;;  %p507_p1 = scmp.lt.s32.totalorder %s1623_s24, 3  ;;  %s1384_s13 = sshll.u32 %s2660_s27, 4  ;;  %s2685_s13 = int_to_ptr.vmem [resolvable:$true] %s1384_s13 }
  0x95   : > { %723 = vmatprep.subr.bf16.mxu0 %v1931_v17  ;;  %1751 = vmatprep.subr.bf16.mxu1 %v2334_v0  ;;  %s1714_s19 = sshll.u32 %s2311_s16, 7  ;;  %s1715_s29 = sshll.u32 %s2311_s16, 8 }
  0x96   : > { %s2845_s24 = smov (!%p507_p1, %s1623_s24), 3  ;;  %s1360_s21 = scalar_lea.sflag [#allocation7], %s2566_s0 }
  0x97   : > { %s509_s11 = scalar_lea.vmem %s2798_s7, %s2845_s24  ;;  %s2197_s23 = scalar_lea.vmem %s2685_s13, 256 }
  0x98   : > { %724 = vmatpush1.bf16.msra.mxu0 %v1933_v19  ;;  %1752 = vmatpush3.bf16.msra.mxu1 %v1962_v28  ;;  %v565_v19 = vrot.slane %v560_v16, %v2625_v15  ;;  %p2198_p4 = scmp.ne.s32.totalorder %s2685_s13, %s2197_s23  ;;  %p2832_p8 = scmp.ne.s32.totalorder %s2828_s28, 0 }
  0x99   : > { %725 = vmatprep.subr.bf16.mxu0 %v1934_v20  ;;  %1753 = vmatprep.subr.bf16.mxu1 %v2334_v0  ;;  %v833_v20 = vrot.slane %v828_v18, %v2625_v15  ;;  %s2338_s22 = smov [#allocation16]  }
  0x9a   : > { %p2199_p13 = pnand %p2198_p4, %p2832_p8  ;;  %s2201_s24 = sshll.u32 %s2338_s22, 4  ;;  %s2202_s24 = int_to_ptr.vmem [resolvable:$false] %s2201_s24 }
  0x9b   : > { %s2203_s30 = scalar_lea.vmem %s2202_s24, 512  ;;  %p2204_p3 = scmp.lt.s32.totalorder %s2685_s13, %s2202_s24 }
  0x9c   : > { %726 = vmatpush1.bf16.msra.mxu0 %v1936_v22  ;;  %1754 = vmatpush3.bf16.msra.mxu1 %v1966_v32  ;;  %v2632_v22 = vsub.s32 1, %v563_v13  ;;  %p2200_p0 = pneg %p2199_p13  ;;  %p2205_p2 = scmp.lt.s32.totalorder %s2203_s30, %s2197_s23 }
  0x9d   : > { %973 = vmatprep.subr.bf16.mxu0 %v1941_v23  ;;  %1759 = vmatprep.subr.bf16.mxu1 %v2334_v0 }
  0x9e   : > { %v569_v28 = vrot.slane %v560_v16, %v2632_v22  ;;  %p2206_p11 = por %p2205_p2, %p2204_p3 }
  0x9f   : > { %744 = vmatmul.mubr.bf16.vlgmr.msra.gmra.mxu0 %v1938_v25  ;;  %1756 = vmatmul.mubr.bf16.vlgmr.msra.gmra.mxu1 %v1938_v25 }
  0xa0   : > { %974 = vmatpush1.bf16.msra.mxu0 %v1939_v26  ;;  %1005 = vmatprep.mubr.bf16.mxu0 %v2335_v1  ;;  %v837_v26 = vrot.slane %v828_v18, %v2632_v22  ;;  %p2207_p10 = pnand %p2206_p11, %p2200_p0 }
  0xa1   : > { %975 = vmatprep.subr.bf16.mxu0 %v1945_v27  ;;  %1760 = vmatpush3.bf16.msra.mxu1 %v1970_v34 }
  0xa2   : > { %1775 = vmatprep.mubr.msk.bf16.mxu1 %vm2336_vm0, %v2334_v0  ;;  %1761 = vmatprep.subr.bf16.mxu1 %v2334_v0 }
  0xa4   : > { %976 = vmatpush1.bf16.msra.mxu0 %v1943_v29 }
  0xa5   : > { %977 = vmatprep.subr.bf16.mxu0 %v1949_v30  ;;  %1762 = vmatpush3.bf16.msra.mxu1 %v1971_v37 }
  0xa6   : > { %1763 = vmatprep.subr.bf16.mxu1 %v2334_v0 }
  0xa8   : > { %978 = vmatpush1.bf16.msra.mxu0 %v1947_v31 }
  0xa9   : > { %979 = vmatprep.subr.bf16.mxu0 %v1953_v33  ;;  %1764 = vmatpush3.bf16.msra.mxu1 %v1972_v40 }
  0xaa   : > { %1765 = vmatprep.subr.bf16.mxu1 %v2334_v0 }
  0xac   : > { %980 = vmatpush1.bf16.msra.mxu0 %v1951_v35 }
  0xad   : > { %981 = vmatprep.subr.bf16.mxu0 %v1957_v36  ;;  %1766 = vmatpush3.bf16.msra.mxu1 %v1973_v43 }
  0xae   : > { %1767 = vmatprep.subr.bf16.mxu1 %v2334_v0 }
  0xb0   : > { %982 = vmatpush1.bf16.msra.mxu0 %v1955_v38 }
  0xb1   : > { %983 = vmatprep.subr.bf16.mxu0 %v1961_v39  ;;  %1768 = vmatpush3.bf16.msra.mxu1 %v1974_v46 }
  0xb2   : > { %1769 = vmatprep.subr.bf16.mxu1 %v2334_v0 }
  0xb4   : > { %984 = vmatpush1.bf16.msra.mxu0 %v1959_v41 }
  0xb5   : > { %985 = vmatprep.subr.bf16.mxu0 %v1965_v42  ;;  %1770 = vmatpush3.bf16.msra.mxu1 %v1975_v50 }
  0xb6   : > { %1771 = vmatprep.subr.bf16.mxu1 %v2334_v0 }
  0xb8   : > { %986 = vmatpush1.bf16.msra.mxu0 %v1963_v44 }
  0xb9   : > { %987 = vmatprep.subr.bf16.mxu0 %v1969_v45  ;;  %1772 = vmatpush3.bf16.msra.mxu1 %v1976_v52 }
  0xba   : > { %1773 = vmatprep.subr.bf16.mxu1 %v2334_v0 }
  0xbc   : > { %988 = vmatpush1.bf16.msra.mxu0 %v1967_v47 }
  0xbd   : > { %1774 = vmatpush3.bf16.msra.mxu1 %v1977_v53  ;;  %1232 = vmatprep.subr.bf16.mxu0 %v1980_v54 }
  0xbf   : > { %1006 = vmatmul.mubr.bf16.vlgmr.msra.gmra.mxu0 %v795_v51 }
  0xc0   : > { %1264 = vmatprep.mubr.bf16.mxu0 %v2335_v1  ;;  %1776 = vmatmul.mubr.bf16.vlgmr.msra.gmra.mxu1 %v795_v51  ;;  %v1995_v1 = vld [vmem:[%s2570_s12 + $0x24] ss:$8 sps:$4 sm:$0xff]   ;;  %s2692_s12 = scalar_lea.hbm %s2799_s8, %s1714_s19 }
  0xc1   : > { %1233 = vmatpush1.bf16.msra.mxu0 %v1978_v55  ;;  %v572_v55 = vsub.s32 2, %v563_v13 }
  0xc2   : > { %1234 = vmatprep.subr.bf16.mxu0 %v1983_v56 }
  0xc3   : > { %v841_v56 = vrot.slane %v828_v18, %v572_v55 }
  0xc5   : > { %1235 = vmatpush1.bf16.msra.mxu0 %v1981_v57 }
  0xc6   : > { %1236 = vmatprep.subr.bf16.mxu0 %v1986_v58 }
  0xc9   : > { %1237 = vmatpush1.bf16.msra.mxu0 %v1984_v59  ;;  %v573_v59 = vrot.slane %v560_v16, %v572_v55 }
  0xca   : > { %1238 = vmatprep.subr.bf16.mxu0 %v1989_v60 }
  0xcd   : > { %1239 = vmatpush1.bf16.msra.mxu0 %v1987_v61 }
  0xce   : > { %1240 = vmatprep.subr.bf16.mxu0 %v1992_v62 }
  0xd1   : > { %1241 = vmatpush1.bf16.msra.mxu0 %v1990_v63 }
  0xd2   : > { %1242 = vmatprep.subr.bf16.mxu0 %v1995_v1 }
  0xd5   : > { %1243 = vmatpush1.bf16.msra.mxu0 %v1993_v2 }
  0xd6   : > { %1244 = vmatprep.subr.bf16.mxu0 %v1998_v3 }
  0xd9   : > { %1245 = vmatpush1.bf16.msra.mxu0 %v1996_v4 }
  0xda   : > { %1246 = vmatprep.subr.bf16.mxu0 %v2001_v5 }
  0xdd   : > { %1247 = vmatpush1.bf16.msra.mxu0 %v1999_v6 }
 0x15f   : > { %v788_v7 = vpop.f32.mrf.mxu1  ;;  %v745_v12 = vpop.f32.mrf.mxu0 }
 0x160   : > { %v746_v24 = vadd.f32 %v745_v12, %v565_v19  ;;  %v789_v1 = vadd.f32 %v788_v7, %v573_v59 }
 0x161   : > { %v1757_v8 = vpop.f32.mrf.mxu1  ;;  %v747_v14 = vpop.f32.mrf.mxu0 }
 0x162   : > { %v748_v36 = vadd.f32 %v747_v14, %v569_v28 }
 0x163   : > { %v2623_v9 = vpop.f32.mrf.mxu1  ;;  %v749_v17 = vpop.f32.mrf.mxu0 }
 0x164   : > { %v750_v31 = vadd.f32 %v749_v17, %v565_v19  ;;  %v792_v6 = vadd.f32 %v2623_v9, %v573_v59 }
 0x165   : > { %v1758_v10 = vpop.f32.mrf.mxu1  ;;  %v751_v21 = vpop.f32.mrf.mxu0 }
 0x166   : > { %v752_v41 = vadd.f32 %v751_v21, %v569_v28 }
 0x17f   : > { %v1007_v23 = vpop.f32.mrf.mxu0 }
 0x180   : > { %v1008_v25 = vadd.f32 %v1007_v23, %v833_v20  ;;  %v1050_v42 = vpop.f32.mrf.mxu1 }
 0x181   : > { %v1009_v27 = vpop.f32.mrf.mxu0  ;;  %v1051_v61 = vadd.f32 %v1050_v42, %v841_v56 }
 0x182   : > { %v1057_v29 = vadd.f32 %v1008_v25, %v746_v24  ;;  %v1010_v33 = vadd.f32 %v1009_v27, %v837_v26  ;;  %v1777_v44 = vpop.f32.mrf.mxu1 }
 0x183   : > { %v1011_v30 = vpop.f32.mrf.mxu0 }
 0x184   : > { %v1675_v32 = vmul.f32 -1.442695, %v1057_v29  ;;  %v1012_v34 = vadd.f32 %v1011_v30, %v833_v20  ;;  %v1071_v39 = vadd.f32 %v1010_v33, %v748_v36  ;;  %v1053_v46 = vpop.f32.mrf.mxu1 }
 0x185   : > { %v1013_v35 = vpop.f32.mrf.mxu0  ;;  %v1054_v4 = vadd.f32 %v1053_v46, %v841_v56 }
 0x186   : > { %2003 = vpow2.f32 %v1675_v32  ;;  %v1058_v37 = vadd.f32 %v1012_v34, %v750_v31  ;;  %v1014_v38 = vadd.f32 %v1013_v35, %v837_v26  ;;  %v1677_v45 = vmul.f32 -1.442695, %v1071_v39  ;;  %v1778_v50 = vpop.f32.mrf.mxu1 }
 0x188   : > { %v1676_v40 = vmul.f32 -1.442695, %v1058_v37  ;;  %v1072_v43 = vadd.f32 %v1014_v38, %v752_v41 }
 0x18a   : > { %2005 = vpow2.f32 %v1676_v40  ;;  %v1678_v47 = vmul.f32 -1.442695, %v1072_v43 }
 0x18b   : > { %2007 = vpow2.f32 %v1677_v45 }
 0x18c   : > { %2009 = vpow2.f32 %v1678_v47 }
 0x193   : > { %v2004_v51 = vpop.eup %2003 }
 0x194   : > { %v1065_v52 = vadd.f32 1.0, %v2004_v51 }
 0x196   : > { %2011 = vrcp.f32 %v1065_v52 }
 0x197   : > { %v2006_v53 = vpop.eup %2005 }
 0x198   : > { %v1066_v54 = vadd.f32 1.0, %v2006_v53  ;;  %v2008_v57 = vpop.eup %2007 }
 0x199   : > { %v2010_v58 = vpop.eup %2009  ;;  %v1079_v60 = vadd.f32 1.0, %v2008_v57 }
 0x19a   : > { %2013 = vrcp.f32 %v1066_v54  ;;  %v1080_v63 = vadd.f32 1.0, %v2010_v58 }
 0x19b   : > { %2015 = vrcp.f32 %v1079_v60 }
 0x19c   : > { %2017 = vrcp.f32 %v1080_v63 }
 0x1a3   : > { %v2012_v62 = vpop.eup %2011 }
 0x1a4   : > { %v1085_v2 = vmul.f32 %v2012_v62, %v1051_v61 }
 0x1a6   : > { %v1087_v3 = vadd.f32 %v1085_v2, %v789_v1 }
 0x1a7   : > { %v2014_v5 = vpop.eup %2013 }
 0x1a8   : > { %2019 = vtanh.f32 %v1087_v3  ;;  %v1086_v8 = vmul.f32 %v2014_v5, %v1054_v4  ;;  %v2016_v11 = vpop.eup %2015 }
 0x1a9   : > { %v2018_v12 = vpop.eup %2017  ;;  %v1091_v13 = vsub.f32 1.0, %v2016_v11  ;;  %v1095_v7 = vmul.f32 %v2016_v11, %v2597_v48  ;;  %v2337_v48 = vmov -1e+30  }
 0x1aa   : > { %v1088_v10 = vadd.f32 %v1086_v8, %v792_v6  ;;  %v1092_v18 = vsub.f32 1.0, %v2018_v12  ;;  %v1096_v20 = vmul.f32 %v2018_v12, %v2599_v49  ;;  %1112 = vst.msk [vmem:[#allocation2] sm:$0xff] %vm1111_vm1, %v2337_v48  ;;  %1113 = vst.msk [vmem:[#allocation2 + $0x8] sm:$0xff] %vm1111_vm1, %v2337_v48  ;;  %v1134_v49 = vld [vmem:[%s509_s11] sm:$0x3] }
 0x1ab   : > { %v1139_v25 = vrot.slane %v1134_v49, %v2625_v15  ;;  %v1143_v26 = vrot.slane %v1134_v49, %v2632_v22 }
 0x1ac   : > { %2021 = vtanh.f32 %v1088_v10 }
 0x1b1   : > { %v2664_v22 = vld [vmem:[#allocation2] sm:$0xff]  ;;  %v2669_v39 = vld [vmem:[#allocation2 + $0x8] sm:$0xff] }
 0x1b5   : > { %v2020_v14 = vpop.eup %2019 }
 0x1b6   : > { %v1093_v16 = vmul.f32 %v2020_v14, %v1091_v13 }
 0x1b8   : > { %v1097_v17 = vadd.f32 %v1095_v7, %v1093_v16 }
 0x1b9   : > { %v2022_v19 = vpop.eup %2021 }
 0x1ba   : > { %v1094_v9 = vmul.f32 %v2022_v19, %v1092_v18  ;;  %1099 = vst [vmem:[%s2642_s3] sm:$0xff] %v1097_v17 }
 0x1bc   : > { %v1098_v21 = vadd.f32 %v1096_v20, %v1094_v9 }
 0x1be   : > { %v1719_v23 = vpack.c.bf16 %v1098_v21, %v1097_v17  ;;  %1100 = vst [vmem:[%s2642_s3 + $0x8] sm:$0xff] %v1098_v21 }
 0x1c0   : > { %1720 = vst [vmem:[#allocation4] sm:$0xff] %v1719_v23  }
 0x1c7   : > { %v2002_v24 = vld [vmem:[#allocation4] sm:$0xff]  }
 0x1c8   : > { %1265 = vmatmul.mubr.bf16.vlgmr.msra.gmra.mxu0 %v2002_v24 }
 0x288   : > { %v1266_v27 = vpop.f32.mrf.mxu0 }
 0x289   : > { %v1267_v29 = vadd.f32 %v1266_v27, %v1139_v25 }
 0x28a   : > { %v1268_v28 = vpop.f32.mrf.mxu0 }
 0x28b   : > { %v1269_v30 = vadd.f32 %v1268_v28, %v1143_v26 }
 0x28c   : > { %v1270_v31 = vpop.f32.mrf.mxu0 }
 0x28d   : > { %v1712_v32 = vpack.c.bf16 %v1269_v30, %v1267_v29  ;;  %v1291_v0 = vmax.f32 %v1267_v29, %v1269_v30  ;;  %v1271_v34 = vadd.f32 %v1270_v31, %v1139_v25 }
 0x28e   : > { %v1272_v33 = vpop.f32.mrf.mxu0 }
 0x28f   : > { %1287 = vst [vmem:[%s2660_s27] sm:$0xff] %v1712_v32  ;;  %v1273_v35 = vadd.f32 %v1272_v33, %v1143_v26  ;;  %1292 = vmax.xlane.f32.xlu0 %v1291_v0 }
 0x291   : > { %v1713_v15 = vpack.c.bf16 %v1273_v35, %v1271_v34  ;;  %v1294_v36 = vmax.f32 %v1271_v34, %v1273_v35 }
 0x293   : > { %1288 = vst [vmem:[%s2660_s27 + $0x8] sm:$0xff] %v1713_v15  ;;  %1295 = vmax.xlane.f32.xlu0 %v1294_v36 }
 0x318   : > { %v1293_v37 = vpop.xlane.xlu0 %1292 }
 0x319   : > { %v2667_v38 = vmax.f32 %v2664_v22, %v1293_v37 }
 0x31b   : > { %v1301_v40 = vsub.f32 %v2664_v22, %v2667_v38  ;;  %1342 = vst.msk [vmem:[#allocation2] sm:$0xff] %vm1111_vm1, %v2667_v38  ;;  %1311 = vperm.xlu1 %1911, %v2667_v38  }
 0x31c   : > { %v1296_v41 = vpop.xlane.xlu0 %1295 }
 0x31d   : > { %v2677_v42 = vmax.f32 %v2669_v39, %v1296_v41 }
 0x31f   : > { %v1302_v43 = vsub.f32 %v2669_v39, %v2677_v42  ;;  %1343 = vst.msk [vmem:[#allocation2 + $0x8] sm:$0xff] %vm1111_vm1, %v2677_v42  ;;  %1316 = vperm.xlu1 %1911, %v2677_v42  }
 0x396   : > { %v1312_v44 = vpop.permute.xlu1 %1311 }
 0x397   : > { %v1319_v45 = vsub.f32 %v1267_v29, %v1312_v44  ;;  %v1320_v46 = vsub.f32 %v1269_v30, %v1312_v44 }
 0x399   : > { %v1323_v47 = vmul.f32 1.442695, %v1319_v45  ;;  %v1325_v50 = vmul.f32 1.442695, %v1320_v46 }
 0x39a   : > { %v1317_v51 = vpop.permute.xlu1 %1316 }
 0x39b   : > { %2023 = vpow2.f32 %v1323_v47  ;;  %v1321_v52 = vsub.f32 %v1271_v34, %v1317_v51  ;;  %v1322_v53 = vsub.f32 %v1273_v35, %v1317_v51 }
 0x39c   : > { %2025 = vpow2.f32 %v1325_v50 }
 0x39d   : > { %v1327_v54 = vmul.f32 1.442695, %v1321_v52  ;;  %v1329_v55 = vmul.f32 1.442695, %v1322_v53 }
 0x39f   : > { %2027 = vpow2.f32 %v1327_v54 }
 0x3a0   : > { %2029 = vpow2.f32 %v1329_v55 }
 0x3a8   : > { %v2024_v56 = vpop.eup %2023 }
 0x3a9   : > { %v2026_v57 = vpop.eup %2025 }
 0x3aa   : > { %v1331_v58 = vadd.f32 %v2026_v57, %v2024_v56 }
 0x3ac   : > { %v2028_v59 = vpop.eup %2027  ;;  %1332 = vadd.xlane.f32.xlu0 %v1331_v58 }
 0x3ad   : > { %v2030_v60 = vpop.eup %2029 }
 0x3ae   : > { %v1334_v61 = vadd.f32 %v2030_v60, %v2028_v59 }
 0x3b0   : > { %1335 = vadd.xlane.f32.xlu1 %v1334_v61 }
 0x3b1   : > { %2210 = shalt.err (!%p2207_p10)
}
 0x3b2   : > { %s2211_s20 = scalar_lea.hbm %s2692_s12, 256  ;;  %s2215_s19 = scalar_lea.hbm %s2799_s8, 512 }
 0x3b3   : > { %p2212_p7 = scmp.ne.s32.totalorder %s2692_s12, %s2211_s20  ;;  %p2216_p9 = scmp.lt.s32.totalorder %s2692_s12, %s2799_s8 }
 0x3b4   : > { %p2217_p5 = scmp.lt.s32.totalorder %s2215_s19, %s2211_s20 }
 0x3b5   : > { %p2213_p6 = pnand %p2212_p7, %p2832_p8 }
 0x3b6   : > { %p2218_p1 = por %p2217_p5, %p2216_p9 }
 0x3b7   : > { %p2214_p12 = pneg %p2213_p6 }
 0x3b9   : > { %p2219_p4 = pnand %p2218_p1, %p2214_p12 }
 0x3bb   : > { %2222 = shalt.err (!%p2219_p4)
}
 0x3bc   : > { %s2339_s23 = smov 128   ;;  %s2340_s22 = smov 256  }
 0x3bd   : > { %s2341_s24 = smov 8   ;;  %s2724_s11 = scalar_lea.hbm %s2801_s10, %s1715_s29 }
 0x3be   : > { %1801 = dma.vmem_to_hbm [thread:$0]  (%p2832_p8), %s2685_s13, 256, %s2692_s12, %s1360_s21, %s2339_s23, %s2340_s22, %s2341_s24  }
 0x3bf   : > { %s1403_s27 = sshll.u32 %s2642_s3, 4  ;;  %s1370_s19 = scalar_lea.sflag [#allocation18], %s2566_s0  ;;  %s2727_s27 = int_to_ptr.vmem [resolvable:$true] %s1403_s27 }
 0x3c0   : > { %s2223_s2 = scalar_lea.vmem %s2727_s27, 256  ;;  %s2342_s25 = smov [#allocation17]  }
 0x3c1   : > { %p2224_p13 = scmp.ne.s32.totalorder %s2727_s27, %s2223_s2  ;;  %s2227_s13 = sshll.u32 %s2342_s25, 4  ;;  %s2228_s13 = int_to_ptr.vmem [resolvable:$false] %s2227_s13 }
 0x3c2   : > { %s2229_s12 = scalar_lea.vmem %s2228_s13, 512  ;;  %p2230_p2 = scmp.lt.s32.totalorder %s2727_s27, %s2228_s13 }
 0x3c3   : > { %p2225_p0 = pnand %p2224_p13, %p2832_p8  ;;  %p2231_p11 = scmp.lt.s32.totalorder %s2229_s12, %s2223_s2 }
 0x3c5   : > { %p2226_p3 = pneg %p2225_p0  ;;  %p2232_p10 = por %p2231_p11, %p2230_p2 }
 0x3c7   : > { %p2233_p7 = pnand %p2232_p10, %p2226_p3 }
 0x3c9   : > { %2236 = shalt.err (!%p2233_p7)
}
 0x3ca   : > { %s2237_s3 = scalar_lea.hbm %s2724_s11, 256  ;;  %s2241_s21 = scalar_lea.hbm %s2801_s10, 512 }
 0x3cb   : > { %p2238_p6 = scmp.ne.s32.totalorder %s2724_s11, %s2237_s3  ;;  %p2242_p5 = scmp.lt.s32.totalorder %s2724_s11, %s2801_s10 }
 0x3cc   : > { %p2243_p1 = scmp.lt.s32.totalorder %s2241_s21, %s2237_s3 }
 0x3cd   : > { %p2239_p12 = pnand %p2238_p6, %p2832_p8 }
 0x3ce   : > { %p2244_p4 = por %p2243_p1, %p2242_p5 }
 0x3cf   : > { %p2240_p9 = pneg %p2239_p12 }
 0x3d1   : > { %p2245_p13 = pnand %p2244_p4, %p2240_p9 }
 0x3d3   : > { %2248 = shalt.err (!%p2245_p13)
}
 0x3d4   : > { %1802 = dma.vmem_to_hbm [thread:$0]  (%p2832_p8), %s2727_s27, 256, %s2724_s11, %s1370_s19, %s2339_s23, %s2339_s23, %s2341_s24   ;;  %v1303_v62 = vmul.f32 1.442695, %v1301_v40  ;;  %v1305_v63 = vmul.f32 1.442695, %v1302_v43  ;;  %v1299_v2 = vld [vmem:[#allocation3] sm:$0xff] }
 0x3d5   : > { %v1300_v6 = vld [vmem:[#allocation3 + $0x8] sm:$0xff]  ;;  %p514_p8 = scmp.lt.s32.totalorder %s2311_s16, 1  ;;  %v1347_v17 = vld [vmem:[#allocation2] sm:$0xff]  ;;  %v1348_v9 = vld [vmem:[#allocation2 + $0x8] sm:$0xff] }
 0x3d6   : > { %2031 = vpow2.f32 %v1303_v62 }
 0x3d7   : > { %2033 = vpow2.f32 %v1305_v63  ;;  %s2847_s16 = smov (!%p514_p8, %s2311_s16), 1 }
 0x3d8   : > { %s1709_s28 = sshll.u32 %s2847_s16, 4 }
 0x3d9   : > { %s518_s20 = scalar_lea.vmem %s2800_s9, %s1709_s28 }
 0x3e3   : > { %v2032_v1 = vpop.eup %2031 }
 0x3e4   : > { %v1307_v3 = vmul.f32 %v2032_v1, %v1299_v2  ;;  %v2034_v4 = vpop.eup %2033 }
 0x3e5   : > { %v1308_v10 = vmul.f32 %v2034_v4, %v1300_v6 }
 0x435   : > { %v1333_v5 = vpop.xlane.xlu0 %1332 }
 0x436   : > { %v1337_v8 = vadd.f32 %v1333_v5, %v1307_v3 }
 0x438   : > { %1340 = vst.msk [vmem:[#allocation3] sm:$0xff] %vm1111_vm1, %v1337_v8 }
 0x439   : > { %v1336_v11 = vpop.xlane.xlu1 %1335 }
 0x43a   : > { %v1338_v12 = vadd.f32 %v1336_v11, %v1308_v10 }
 0x43c   : > { %1341 = vst.msk [vmem:[#allocation3 + $0x8] sm:$0xff] %vm1111_vm1, %v1338_v12 }
 0x43f   : > { %v1349_v13 = vld [vmem:[#allocation3] sm:$0xff] }
 0x440   : > { %2035 = vlog2.f32 %v1349_v13 }
 0x443   : > { %v1350_v14 = vld [vmem:[#allocation3 + $0x8] sm:$0xff] }
 0x444   : > { %2037 = vlog2.f32 %v1350_v14 }
 0x44d   : > { %v2036_v7 = vpop.eup %2035 }
 0x44e   : > { %v1352_v16 = vmul.f32 0.6931472, %v2036_v7 }
 0x450   : > { %v1355_v18 = vadd.f32 %v1352_v16, %v1347_v17 }
 0x451   : > { %v2038_v19 = vpop.eup %2037 }
 0x452   : > { %1357 = vst.msk [vmem:[%s518_s20] sm:$0xff] %vm1111_vm1, %v1355_v18  ;;  %v1354_v20 = vmul.f32 0.6931472, %v2038_v19 }
 0x454   : > { %v1356_v21 = vadd.f32 %v1354_v20, %v1348_v9 }
 0x456   : > { %1358 = vst.msk [vmem:[%s518_s20 + $0x8] sm:$0xff] %vm1111_vm1, %v1356_v21 }
 0x457 PF: > { %s2833_s11 = sld [smem:[#allocation25_spill]]  ;;  %p2836_p3 = scmp.ge.s32.totalorder %s2319_s18, 2 }
 0x458   : > { %s2834_s27 = sld [smem:[#allocation26_spill]] }
 0x45d   : > { %s1418_s16 = sand.u32 1, %s2833_s11  }
 0x45e   : > { %p2835_p0 = scmp.ne.s32.totalorder %s2834_s27, 0  ;;  %s1419_s19 = scalar_lea.sflag [#allocation7], %s1418_s16 }
 0x460   : > { %p1826_p2 = pnand %p2836_p3, %p2835_p0 }
 0x462   : > { %p1827_p11 = pneg %p1826_p2 }
 0x464   : > { %2290 = dma.done.wait (%p1827_p11), %s1419_s19, 256  }
 0x465   : > { %2292 = vsyncadd (%p1827_p11), %s1419_s19, 4294967040  ;;  %s1436_s2 = scalar_lea.sflag [#allocation18], %s1418_s16 }
 0x466   : > { %2294 = dma.done.wait (%p1827_p11), %s1436_s2, 256  }
 0x467   : > { %2296 = vsyncadd (%p1827_p11), %s1436_s2, 4294967040  ;;  %s33_s18 = sadd.s32 1, %s2319_s18   ;;  %s2837_s13 = smov %s2303_s14 }
 0x468   : > { %p30_p10 = scmp.ge.s32.totalorder %s33_s18, 4   ;;  %s2838_s14 = smov %s2307_s15 }
 0x469   : > { %s2839_s15 = smov %s2534_s1  ;;  %s2840_s16 = smov %s2315_s17 }
 0x46a   : > { %s2841_s17 = smov %s2843_s26  ;;  %32 = sbr.rel (!%p30_p10) target bundleno = 16 (0x10), region = 158 }
 0x46f   :  { %1441 = vsyncpa [#allocation6], 1 }
 0x470   :  { %1443 = vsyncpa [#allocation6 + $0x1], 1 }
 0x471   :  { %1444 = vsyncpa [#allocation9], 1 }
 0x472   :  { %1445 = vsyncpa [#allocation12], 1 }
 0x473   :  { %1446 = vsyncpa [#allocation15], 1 }
 0x474   :  { %1448 = vsyncpa [#allocation15 + $0x1], 1 }
 0x475   :  { %1449 = vsyncpa [#allocation7], 1 }
 0x476   :  { %1451 = vsyncpa [#allocation7 + $0x1], 1 }
 0x477   :  { %1452 = vsyncpa [#allocation18], 1 }
 0x478   :  { %1454 = vsyncpa [#allocation18 + $0x1], 1 }

// kernel: tpu_custom_call.1
= control target key start
LH: loop header
LB: loop body
LE: loop exit
PB: predicated region body
PF: predicated region fallthrough
CT: control target
= control target key end

     0   :  { %s2791_s0 = inlined_call_operand.hbm [shape: bf16[16,128], index: 0, kind: input, shape index: {}]   ;;  %s2792_s1 = inlined_call_operand.hbm [shape: f32[16,128], index: 1, kind: input, shape index: {}]   ;;  %s2793_s2 = inlined_call_operand.hbm [shape: bf16[128,384], index: 2, kind: input, shape index: {}]   ;;  %s2794_s3 = inlined_call_operand.hbm [shape: bf16[128,384], index: 3, kind: input, shape index: {}]   ;;  %s2795_s4 = inlined_call_operand.vmem [shape: f32[1,384], index: 4, kind: input, shape index: {}]   ;;  %s2796_s5 = inlined_call_operand.hbm [shape: f32[1,384], index: 5, kind: input, shape index: {}]   ;;  %s2797_s6 = inlined_call_operand.hbm [shape: bf16[128,512], index: 6, kind: input, shape index: {}]   ;;  %s2798_s7 = inlined_call_operand.vmem [shape: f32[1,512], index: 7, kind: input, shape index: {}]   ;;  %s2799_s8 = inlined_call_operand.hbm [shape: bf16[16,512], index: 8, kind: output, shape index: {0}]   ;;  %s2800_s9 = inlined_call_operand.vmem [shape: f32[2,16,1], index: 9, kind: output, shape index: {1}]   ;;  %s2801_s10 = inlined_call_operand.hbm [shape: f32[2,16,128], index: 10, kind: output, shape index: {2}]  }
   0x1   :  { %2809 = sst [smem:[#allocation27_spill]] %s2791_s0 }
   0x2   :  { %2810 = sst [smem:[#allocation28_spill]] %s2792_s1 }
   0x3   :  { %2811 = sst [smem:[#allocation29_spill]] %s2793_s2 }
   0x4   :  { %2812 = sst [smem:[#allocation30_spill]] %s2794_s3 }
   0x5   :  { %16 = vsyncpa [#allocation6], 0 }
   0x6   :  { %17 = vsyncpa [#allocation9], 0 }
   0x7   :  { %18 = vsyncpa [#allocation12], 0 }
   0x8   :  { %19 = vsyncpa [#allocation15], 0 }
   0x9   :  { %21 = vsyncpa [#allocation15 + $0x1], 0 }
   0xa   :  { %22 = vsyncpa [#allocation7], 0 }
   0xb   :  { %24 = vsyncpa [#allocation7 + $0x1], 0 }
   0xc   :  { %25 = vsyncpa [#allocation18], 0 }
   0xd   :  { %27 = vsyncpa [#allocation18 + $0x1], 0  ;;  %s2398_s13 = smov 0   ;;  %s2400_s14 = smov 0  }
   0xe   :  { %s2402_s15 = smov 0   ;;  %s2404_s16 = smov 0  }
   0xf   :  { %s2406_s17 = smov 0   ;;  %s2408_s18 = smov 0  }
  0x10 LB: > { %2813 = sst [smem:[#allocation25_spill]] %s2299_s13  ;;  %s1602_s19 = sadd.s32 4294967295, %s2319_s18   ;;  %s2319_s18 = sphi %s2408_s18, %s33_s18   ;;  %s2315_s17 = sphi %s2406_s17, %s2841_s17   ;;  %s2311_s16 = sphi %s2404_s16, %s2840_s16   ;;  %s2307_s15 = sphi %s2402_s15, %s2839_s15   ;;  %s2303_s14 = sphi %s2400_s14, %s2838_s14   ;;  %s2299_s13 = sphi %s2398_s13, %s2837_s13  }
  0x11   : > { %s1603_s20 = sadd.s32 4294967294, %s2319_s18   ;;  %p193_p0 = scmp.ne.s32.totalorder %s2303_s14, %s2299_s13 }
  0x12   : > { %p2432_p1 = scmp.eq.s32.totalorder %s1602_s19, 0  ;;  %p2436_p2 = scmp.eq.s32.totalorder %s1602_s19, 1 }
  0x13   : > { %p253_p3 = scmp.eq.s32.totalorder %s1603_s20, 1  ;;  %p1604_p5 = scmp.ge.s32.totalorder %s2319_s18, 1 }
  0x14   : > { %p2442_p4 = por %p2432_p1, %p193_p0  ;;  %p312_p7 = scmp.lt.s32.totalorder %s2319_s18, 3 }
  0x15   : > { %p2447_p6 = por %p253_p3, %p193_p0  ;;  %s2321_s26 = smov [#allocation8]  }
  0x16   : > { %p2452_p8 = pnand %p1604_p5, %p312_p7  ;;  %s337_s27 = sshll.u32 %s2321_s26, 4  ;;  %s338_s27 = int_to_ptr.vmem [resolvable:$true] %s337_s27 }
  0x17   : > { %s2817_s24 = scalar_select %p2447_p6, 1, 0 }
  0x18   : > { %p1805_p9 = pneg %p2452_p8  ;;  %s2322_s29 = smov [#allocation11]  }
  0x19   : > { %2818 = sst [smem:[#allocation26_spill]] %s2817_s24  ;;  %s363_s30 = sshll.u32 %s2322_s29, 4  ;;  %s364_s30 = int_to_ptr.vmem [resolvable:$true] %s363_s30 }
  0x1a   : > { %p2461_p11 = pnand %p1805_p9, %p2432_p1  ;;  %s2050_s12 = scalar_lea.vmem %s338_s27, 256 }
  0x1b   : > { %p2051_p13 = scmp.ne.s32.totalorder %s338_s27, %s2050_s12  ;;  %p2058_p5 = scmp.lt.s32.totalorder %s338_s27, %s338_s27 }
  0x1c   : > { %p2467_p12 = pneg %p2461_p11  ;;  %p2059_p7 = scmp.lt.s32.totalorder %s2050_s12, %s2050_s12 }
  0x1e   : > { %p2053_p0 = pnand %p2051_p13, %p2467_p12  ;;  %p2060_p9 = por %p2059_p7, %p2058_p5 }
  0x20   : > { %p2054_p3 = pneg %p2053_p0 }
  0x22   : > { %p2061_p10 = pnand %p2060_p9, %p2054_p3 }
  0x24   : > { %2064 = shalt.err (!%p2061_p10)
}
  0x25   : > { %s2804_s19 = smov 128   ;;  %s2805_s20 = smov 8  }
  0x26   : > { %s2822_s1 = sld [smem:[#allocation28_spill]]  ;;  %s2076_s24 = scalar_lea.vmem %s364_s30, 3072 }
  0x27   : > { %p2077_p13 = scmp.ne.s32.totalorder %s364_s30, %s2076_s24  ;;  %p2084_p3 = scmp.lt.s32.totalorder %s364_s30, %s364_s30 }
  0x28   : > { %p2085_p10 = scmp.lt.s32.totalorder %s2076_s24, %s2076_s24 }
  0x29   : > { %p2079_p0 = pnand %p2077_p13, %p2467_p12 }
  0x2a   : > { %p2086_p7 = por %p2085_p10, %p2084_p3 }
  0x2b   : > { %p2080_p5 = pneg %p2079_p0 }
  0x2c   : > { %1811 = dma.hbm_to_vmem [thread:$0]  (!%p2461_p11), %s2822_s1, 256, %s338_s27, [#allocation9], %s2804_s19, %s2804_s19, %s2805_s20  }
  0x2d   : > { %p2087_p9 = pnand %p2086_p7, %p2080_p5 }
  0x2f   : > { %2090 = shalt.err (!%p2087_p9)
}
  0x30   : > { %s2806_s12 = smov 192   ;;  %s2807_s13 = smov 12  }
  0x31   : > { %s2823_s3 = sld [smem:[#allocation30_spill]]  ;;  %s2327_s29 = smov [#allocation5]  }
  0x32   : > { %s324_s19 = sshll.u32 %s2327_s29, 4  ;;  %s325_s19 = int_to_ptr.vmem [resolvable:$true] %s324_s19 }
  0x33   : > { %s2102_s20 = scalar_lea.vmem %s325_s19, 128  ;;  %p2110_p3 = scmp.lt.s32.totalorder %s325_s19, %s325_s19 }
  0x34   : > { %p2103_p13 = scmp.ne.s32.totalorder %s325_s19, %s2102_s20  ;;  %p2111_p10 = scmp.lt.s32.totalorder %s2102_s20, %s2102_s20 }
  0x36   : > { %p2105_p0 = pnand %p2103_p13, %p2467_p12  ;;  %p2112_p7 = por %p2111_p10, %p2110_p3 }
  0x37   : > { %1817 = dma.hbm_to_vmem [thread:$0]  (!%p2461_p11), %s2823_s3, 3072, %s364_s30, [#allocation12], %s2806_s12, %s2806_s12, %s2807_s13  }
  0x38   : > { %p2106_p5 = pneg %p2105_p0 }
  0x3a   : > { %p2113_p9 = pnand %p2112_p7, %p2106_p5 }
  0x3c   : > { %2116 = shalt.err (!%p2113_p9)
}
  0x3d   : > { %s2328_s24 = smov 64   ;;  %s2329_s1 = smov 4  }
  0x3e   : > { %s2824_s0 = sld [smem:[#allocation27_spill]]  ;;  %s2330_s26 = smov [#allocation10]  }
  0x3f   : > { %s350_s29 = sshll.u32 %s2330_s26, 4  ;;  %s2331_s12 = smov [#allocation13]   ;;  %s351_s29 = int_to_ptr.vmem [resolvable:$true] %s350_s29 }
  0x40   : > { %s380_s13 = sshll.u32 %s2331_s12, 4  ;;  %s2128_s3 = scalar_lea.vmem %s351_s29, 3072  ;;  %s381_s13 = int_to_ptr.vmem [resolvable:$true] %s380_s13 }
  0x41   : > { %p2129_p13 = scmp.ne.s32.totalorder %s351_s29, %s2128_s3  ;;  %p2136_p3 = scmp.lt.s32.totalorder %s351_s29, %s351_s29 }
  0x42   : > { %p2137_p10 = scmp.lt.s32.totalorder %s2128_s3, %s2128_s3 }
  0x43   : > { %p2131_p0 = pnand %p2129_p13, %p2467_p12 }
  0x44   : > { %1808 = dma.hbm_to_vmem [thread:$0]  (!%p2461_p11), %s2824_s0, 128, %s325_s19, [#allocation6], %s2328_s24, %s2328_s24, %s2329_s1  }
  0x45   : > { %p2132_p5 = pneg %p2131_p0  ;;  %p2138_p7 = por %p2137_p10, %p2136_p3 }
  0x47   : > { %p2139_p9 = pnand %p2138_p7, %p2132_p5 }
  0x49   : > { %2142 = shalt.err (!%p2139_p9)
}
  0x4a   : > { %s2825_s20 = smov 12   ;;  %s2826_s27 = smov 192  }
  0x4b   : > { %s2827_s2 = sld [smem:[#allocation29_spill]]  ;;  %s2154_s12 = scalar_lea.vmem %s381_s13, 48 }
  0x4c   : > { %p2155_p6 = scmp.ne.s32.totalorder %s381_s13, %s2154_s12  ;;  %s2161_s3 = scalar_lea.vmem %s381_s13, 64 }
  0x4d   : > { %p2162_p3 = scmp.lt.s32.totalorder %s381_s13, %s381_s13  ;;  %p2163_p5 = scmp.lt.s32.totalorder %s2161_s3, %s2154_s12 }
  0x4e   : > { %p2157_p13 = pnand %p2155_p6, %p2467_p12 }
  0x4f   : > { %p2164_p10 = por %p2163_p5, %p2162_p3 }
  0x50   : > { %p2158_p0 = pneg %p2157_p13 }
  0x51   : > { %1814 = dma.hbm_to_vmem [thread:$0]  (!%p2461_p11), %s2827_s2, 3072, %s351_s29, [#allocation9], %s2826_s27, %s2826_s27, %s2825_s20  }
  0x52   : > { %p2165_p7 = pnand %p2164_p10, %p2158_p0 }
  0x54   : > { %2168 = shalt.err (!%p2165_p7)
}
  0x55   : > { %1820 = dma.hbm_to_vmem [thread:$0]  (!%p2461_p11), %s2796_s5, 48, %s381_s13, [#allocation12]  }
  0x56   : > { %s180_s11 = sadd.s32 1, %s2307_s15  ;;  %s45_s26 = sadd.s32 1, %s2315_s17 }
  0x57   : > { %p187_p6 = scmp.ne.s32.totalorder %s2307_s15, %s2303_s14  ;;  %p47_p12 = scmp.ge.s32.totalorder %s45_s26, 2 }
  0x58   : > { %p188_p9 = scmp.eq.s32.totalorder %s2319_s18, 0  ;;  %p1837_p0 = scmp.lt.s32.totalorder %s2319_s18, 2 }
  0x59   : > { %p2522_p13 = por %p2436_p2, %p187_p6  ;;  %s2843_s26 = smov (%p47_p12, %s45_s26), 0 }
  0x5a   : > { %p189_p3 = por %p188_p9, %p187_p6  ;;  %s391_s29 = sand.u32 1, %s2307_s15  }
  0x5b   : > { %s2828_s28 = scalar_select %p2522_p13, 1, 0 }
  0x5c   : > { %s177_s20 = ssub.s32 %s2315_s17, %s2843_s26  ;;  %s1611_s13 = sshll.u32 %s391_s29, 7 }
  0x5d   : > { %p178_p5 = scmp.eq.s32.totalorder %s177_s20, 0  ;;  %s1708_s27 = sshll.u32 %s2315_s17, 7 }
  0x5e   : > { %s402_s22 = scalar_lea.hbm %s2797_s6, %s1708_s27  ;;  %s395_s3 = scalar_lea.vmem [#allocation14], %s1611_s13 }
  0x5f   : > { %s2534_s1 = scalar_select %p178_p5, %s2307_s15, %s180_s11  }
  0x60   : > { %s403_s24 = sshll.u32 %s395_s3, 4  ;;  %p2541_p2 = pnand %p1837_p0, %p189_p3  ;;  %s404_s24 = int_to_ptr.vmem [resolvable:$true] %s403_s24 }
  0x61   : > { %s392_s0 = scalar_lea.sflag [#allocation15], %s391_s29  ;;  %s2182_s20 = scalar_lea.vmem %s404_s24, 2048 }
  0x62   : > { %p2171_p11 = pneg %p2541_p2  ;;  %p2183_p10 = scmp.ne.s32.totalorder %s404_s24, %s2182_s20 }
  0x63   : > { %s2332_s11 = smov [#allocation14]  }
  0x64   : > { %p2185_p7 = pnand %p2183_p10, %p2171_p11  ;;  %s2187_s2 = sshll.u32 %s2332_s11, 4  ;;  %s2188_s2 = int_to_ptr.vmem [resolvable:$false] %s2187_s2 }
  0x65   : > { %s2189_s27 = scalar_lea.vmem %s2188_s2, 4096  ;;  %p2190_p12 = scmp.lt.s32.totalorder %s404_s24, %s2188_s2 }
  0x66   : > { %p2186_p6 = pneg %p2185_p7  ;;  %p2191_p9 = scmp.lt.s32.totalorder %s2189_s27, %s2182_s20 }
  0x68   : > { %p2192_p5 = por %p2191_p9, %p2190_p12 }
  0x6a   : > { %p2193_p13 = pnand %p2192_p5, %p2186_p6 }
  0x6c   : > { %2196 = shalt.err (!%p2193_p13)
}
  0x6d   : > { %s2333_s13 = smov 256   ;;  %s2830_s19 = smov 8  }
  0x6e   : > { %s2831_s29 = smov 128   ;;  %425 = sbr.rel (%p2452_p8) target bundleno = 1111 (0x457), region = 52 }
  0x6f   : > { %1824 = dma.hbm_to_vmem [thread:$0]  (!%p2541_p2), %s402_s22, 2048, %s404_s24, %s392_s0, %s2333_s13, %s2831_s29, %s2830_s19  }
  0x73   : > { %2274 = dma.done.wait (%p2432_p1), [#allocation6], 128  }
  0x74   : > { %2276 = vsyncadd (%p2432_p1), [#allocation6], 4294967168 }
  0x75   : > { %2278 = dma.done.wait (%p2432_p1), [#allocation9], 3328  }
  0x76   : > { %2280 = vsyncadd (%p2432_p1), [#allocation9], 4294963968 }
  0x77   : > { %2282 = dma.done.wait (%p2432_p1), [#allocation12], 3120  }
  0x78   : > { %2284 = vsyncadd (%p2432_p1), [#allocation12], 4294964176  ;;  %s2566_s0 = sand.u32 1, %s2303_s14  }
  0x79   : > { %s1620_s2 = sshll.u32 %s2566_s0, 7  ;;  %s448_s25 = scalar_lea.sflag [#allocation15], %s2566_s0 }
  0x7a   : > { %s2570_s12 = scalar_lea.vmem [#allocation14], %s1620_s2 }
  0x7b   : > { %2286 = dma.done.wait (%p2442_p4), %s448_s25, 2048  }
  0x7c   : > { %2288 = vsyncadd (%p2442_p4), %s448_s25, 4294965248  ;;  %v2334_v0 = vmov 0.0   ;;  %v2335_v1 = vmov 0   ;;  %vm2336_vm0 = vmmov 0   ;;  %v1913_v2 = vld [vmem:[#allocation10 + $0xac] ss:$12 sps:$4 sm:$0xff]  }
  0x7d   : > { %1739 = vmatprep.subr.bf16.mxu1 %v2334_v0  ;;  %743 = vmatprep.mubr.bf16.mxu0 %v2335_v1  ;;  %v1915_v3 = vld [vmem:[#allocation10 + $0xa8] ss:$12 sps:$4 sm:$0xff]   ;;  %v1918_v5 = vld [vmem:[#allocation10 + $0x90] ss:$12 sps:$4 sm:$0xff]   ;;  %v1921_v7 = vld [vmem:[#allocation10 + $0x78] ss:$12 sps:$4 sm:$0xff]  }
  0x7e   : > { %1755 = vmatprep.mubr.msk.bf16.mxu1 %vm2336_vm0, %v2334_v0  ;;  %1911 = vset.pattern.permute.xlu1 %v2335_v1  ;;  %v1916_v4 = vld [vmem:[#allocation10 + $0x94] ss:$12 sps:$4 sm:$0xff]   ;;  %v1919_v6 = vld [vmem:[#allocation10 + $0x7c] ss:$12 sps:$4 sm:$0xff]   ;;  %v1922_v8 = vld [vmem:[#allocation10 + $0x64] ss:$12 sps:$4 sm:$0xff]  }
  0x7f   : > { %1912 = vset.pattern.permute.xlu0 %v2335_v1  ;;  %711 = vmatprep.subr.bf16.mxu0 %v1913_v2  ;;  %v1924_v9 = vld [vmem:[#allocation10 + $0x60] ss:$12 sps:$4 sm:$0xff]   ;;  %v1937_v10 = vld [vmem:[#allocation10 + $0xb0] ss:$12 sps:$4 sm:$0xff]   ;;  %v1942_v12 = vld [vmem:[#allocation10 + $0x98] ss:$12 sps:$4 sm:$0xff]  }
  0x80   : > { %712 = vmatpush1.bf16.msra.mxu0 %v1915_v3  ;;  %v1925_v11 = vld [vmem:[#allocation10 + $0x4c] ss:$12 sps:$4 sm:$0xff]   ;;  %1740 = vmatpush3.bf16.msra.mxu1 %v1937_v10  ;;  %v1927_v13 = vld [vmem:[#allocation10 + $0x48] ss:$12 sps:$4 sm:$0xff]   ;;  %v1930_v16 = vld [vmem:[#allocation10 + $0x30] ss:$12 sps:$4 sm:$0xff]  }
  0x81   : > { %713 = vmatprep.subr.bf16.mxu0 %v1916_v4  ;;  %1741 = vmatprep.subr.bf16.mxu1 %v2334_v0  ;;  %v1928_v14 = vld [vmem:[#allocation10 + $0x34] ss:$12 sps:$4 sm:$0xff]   ;;  %v1931_v17 = vld [vmem:[#allocation10 + $0x1c] ss:$12 sps:$4 sm:$0xff]   ;;  %v1933_v19 = vld [vmem:[#allocation10 + $0x18] ss:$12 sps:$4 sm:$0xff]  }
  0x82   : > { %v1946_v15 = vld [vmem:[#allocation10 + $0x80] ss:$12 sps:$4 sm:$0xff]   ;;  %v1950_v18 = vld [vmem:[#allocation10 + $0x68] ss:$12 sps:$4 sm:$0xff]   ;;  %v1934_v20 = vld [vmem:[#allocation10 + $0x4] ss:$12 sps:$4 sm:$0xff]  }
  0x83   : > { %v1954_v21 = vld [vmem:[#allocation10 + $0x50] ss:$12 sps:$4 sm:$0xff]   ;;  %v1936_v22 = vld [vmem:[#allocation10] ss:$12 sps:$4 sm:$0xff]   ;;  %v1958_v24 = vld [vmem:[#allocation10 + $0x38] ss:$12 sps:$4 sm:$0xff]  }
  0x84   : > { %714 = vmatpush1.bf16.msra.mxu0 %v1918_v5  ;;  %1742 = vmatpush3.bf16.msra.mxu1 %v1942_v12  ;;  %v1941_v23 = vld [vmem:[#allocation11 + $0xac] ss:$12 sps:$4 sm:$0xff]   ;;  %v1939_v26 = vld [vmem:[#allocation11 + $0xa8] ss:$12 sps:$4 sm:$0xff]   ;;  %v1943_v29 = vld [vmem:[#allocation11 + $0x90] ss:$12 sps:$4 sm:$0xff]  }
  0x85   : > { %715 = vmatprep.subr.bf16.mxu0 %v1919_v6  ;;  %1743 = vmatprep.subr.bf16.mxu1 %v2334_v0  ;;  %v1938_v25 = vld [vmem:[#allocation5] sm:$0xff]   ;;  %v1945_v27 = vld [vmem:[#allocation11 + $0x94] ss:$12 sps:$4 sm:$0xff]   ;;  %v1947_v31 = vld [vmem:[#allocation11 + $0x78] ss:$12 sps:$4 sm:$0xff]   ;;  %s1621_s22 = sshll.u32 %s2566_s0, 4 }
  0x86   : > { %v1962_v28 = vld [vmem:[#allocation10 + $0x20] ss:$12 sps:$4 sm:$0xff]   ;;  %v1949_v30 = vld [vmem:[#allocation11 + $0x7c] ss:$12 sps:$4 sm:$0xff]   ;;  %v1953_v33 = vld [vmem:[#allocation11 + $0x64] ss:$12 sps:$4 sm:$0xff]  }
  0x87   : > { %v1966_v32 = vld [vmem:[#allocation10 + $0x8] ss:$12 sps:$4 sm:$0xff]   ;;  %v1970_v34 = vld [vmem:[#allocation11 + $0xb0] ss:$12 sps:$4 sm:$0xff]   ;;  %v1951_v35 = vld [vmem:[#allocation11 + $0x60] ss:$12 sps:$4 sm:$0xff]  }
  0x88   : > { %716 = vmatpush1.bf16.msra.mxu0 %v1921_v7  ;;  %1744 = vmatpush3.bf16.msra.mxu1 %v1946_v15  ;;  %v1957_v36 = vld [vmem:[#allocation11 + $0x4c] ss:$12 sps:$4 sm:$0xff]   ;;  %v1955_v38 = vld [vmem:[#allocation11 + $0x48] ss:$12 sps:$4 sm:$0xff]   ;;  %v1959_v41 = vld [vmem:[#allocation11 + $0x30] ss:$12 sps:$4 sm:$0xff]  }
  0x89   : > { %717 = vmatprep.subr.bf16.mxu0 %v1922_v8  ;;  %1745 = vmatprep.subr.bf16.mxu1 %v2334_v0  ;;  %v1971_v37 = vld [vmem:[#allocation11 + $0x98] ss:$12 sps:$4 sm:$0xff]   ;;  %v1961_v39 = vld [vmem:[#allocation11 + $0x34] ss:$12 sps:$4 sm:$0xff]   ;;  %v1965_v42 = vld [vmem:[#allocation11 + $0x1c] ss:$12 sps:$4 sm:$0xff]  }
  0x8a   : > { %v1972_v40 = vld [vmem:[#allocation11 + $0x80] ss:$12 sps:$4 sm:$0xff]   ;;  %v1973_v43 = vld [vmem:[#allocation11 + $0x68] ss:$12 sps:$4 sm:$0xff]   ;;  %v1963_v44 = vld [vmem:[#allocation11 + $0x18] ss:$12 sps:$4 sm:$0xff]  }
  0x8b   : > { %v1969_v45 = vld [vmem:[#allocation11 + $0x4] ss:$12 sps:$4 sm:$0xff]   ;;  %v1967_v47 = vld [vmem:[#allocation11] ss:$12 sps:$4 sm:$0xff]   ;;  %v2599_v49 = vld [vmem:[#allocation8 + $0x8] sm:$0xff]  ;;  %s2642_s3 = scalar_lea.vmem [#allocation17], %s1621_s22 }
  0x8c   : > { %718 = vmatpush1.bf16.msra.mxu0 %v1924_v9  ;;  %1746 = vmatpush3.bf16.msra.mxu1 %v1950_v18  ;;  %v1974_v46 = vld [vmem:[#allocation11 + $0x50] ss:$12 sps:$4 sm:$0xff]   ;;  %v1975_v50 = vld [vmem:[#allocation11 + $0x38] ss:$12 sps:$4 sm:$0xff]   ;;  %v1976_v52 = vld [vmem:[#allocation11 + $0x20] ss:$12 sps:$4 sm:$0xff]  }
  0x8d   : > { %719 = vmatprep.subr.bf16.mxu0 %v1925_v11  ;;  %1747 = vmatprep.subr.bf16.mxu1 %v2334_v0  ;;  %v2597_v48 = vld [vmem:[#allocation8] sm:$0xff]  ;;  %v1980_v54 = vld [vmem:[%s2570_s12 + $0x74] ss:$8 sps:$4 sm:$0xff]   ;;  %v1981_v57 = vld [vmem:[%s2570_s12 + $0x60] ss:$8 sps:$4 sm:$0xff]   ;;  %v562_v11 = vlaneseq  ;;  %vm1111_vm1 = vcmask 7168  }
  0x8e   : > { %v795_v51 = vpack.c.bf16 %v2599_v49, %v2597_v48  ;;  %v1977_v53 = vld [vmem:[#allocation11 + $0x8] ss:$12 sps:$4 sm:$0xff]   ;;  %v1986_v58 = vld [vmem:[%s2570_s12 + $0x54] ss:$8 sps:$4 sm:$0xff]   ;;  %v1987_v61 = vld [vmem:[%s2570_s12 + $0x40] ss:$8 sps:$4 sm:$0xff]  }
  0x8f   : > { %v1978_v55 = vld [vmem:[%s2570_s12 + $0x70] ss:$8 sps:$4 sm:$0xff]   ;;  %v1983_v56 = vld [vmem:[%s2570_s12 + $0x64] ss:$8 sps:$4 sm:$0xff]   ;;  %v1992_v62 = vld [vmem:[%s2570_s12 + $0x34] ss:$8 sps:$4 sm:$0xff]  }
  0x90   : > { %720 = vmatpush1.bf16.msra.mxu0 %v1927_v13  ;;  %1748 = vmatpush3.bf16.msra.mxu1 %v1954_v21  ;;  %v1984_v59 = vld [vmem:[%s2570_s12 + $0x50] ss:$8 sps:$4 sm:$0xff]   ;;  %v1989_v60 = vld [vmem:[%s2570_s12 + $0x44] ss:$8 sps:$4 sm:$0xff]   ;;  %v1993_v2 = vld [vmem:[%s2570_s12 + $0x20] ss:$8 sps:$4 sm:$0xff]  }
  0x91   : > { %721 = vmatprep.subr.bf16.mxu0 %v1928_v14  ;;  %1749 = vmatprep.subr.bf16.mxu1 %v2334_v0  ;;  %v1990_v63 = vld [vmem:[%s2570_s12 + $0x30] ss:$8 sps:$4 sm:$0xff]   ;;  %v1998_v3 = vld [vmem:[%s2570_s12 + $0x14] ss:$8 sps:$4 sm:$0xff]   ;;  %v2001_v5 = vld [vmem:[%s2570_s12 + $0x4] ss:$8 sps:$4 sm:$0xff]  }
  0x92   : > { %v1996_v4 = vld [vmem:[%s2570_s12 + $0x10] ss:$8 sps:$4 sm:$0xff]   ;;  %v1999_v6 = vld [vmem:[%s2570_s12] ss:$8 sps:$4 sm:$0xff]   ;;  %v563_v13 = vshrl.u32 %v562_v11, 7  ;;  %1114 = vst.msk [vmem:[#allocation3] sm:$0xff] %vm1111_vm1, %v2334_v0 }
  0x93   : > { %v828_v18 = vld [vmem:[#allocation13] sm:$0x7]  ;;  %1115 = vst.msk [vmem:[#allocation3 + $0x8] sm:$0xff] %vm1111_vm1, %v2334_v0  ;;  %s1623_s24 = sshll.u32 %s2311_s16, 1  ;;  %s2660_s27 = scalar_lea.vmem [#allocation16], %s1621_s22 }
  0x94   : > { %722 = vmatpush1.bf16.msra.mxu0 %v1930_v16  ;;  %1750 = vmatpush3.bf16.msra.mxu1 %v1958_v24  ;;  %v2625_v15 = vsub.s32 0, %v563_v13  ;;  %v560_v16 = vld [vmem:[%s2795_s4] sm:$0x7]  ;;  %p507_p1 = scmp.lt.s32.totalorder %s1623_s24, 3  ;;  %s1384_s13 = sshll.u32 %s2660_s27, 4  ;;  %s2685_s13 = int_to_ptr.vmem [resolvable:$true] %s1384_s13 }
  0x95   : > { %723 = vmatprep.subr.bf16.mxu0 %v1931_v17  ;;  %1751 = vmatprep.subr.bf16.mxu1 %v2334_v0  ;;  %s1714_s19 = sshll.u32 %s2311_s16, 7  ;;  %s1715_s29 = sshll.u32 %s2311_s16, 8 }
  0x96   : > { %s2845_s24 = smov (!%p507_p1, %s1623_s24), 3  ;;  %s1360_s21 = scalar_lea.sflag [#allocation7], %s2566_s0 }
  0x97   : > { %s509_s11 = scalar_lea.vmem %s2798_s7, %s2845_s24  ;;  %s2197_s23 = scalar_lea.vmem %s2685_s13, 256 }
  0x98   : > { %724 = vmatpush1.bf16.msra.mxu0 %v1933_v19  ;;  %1752 = vmatpush3.bf16.msra.mxu1 %v1962_v28  ;;  %v565_v19 = vrot.slane %v560_v16, %v2625_v15  ;;  %p2198_p4 = scmp.ne.s32.totalorder %s2685_s13, %s2197_s23  ;;  %p2832_p8 = scmp.ne.s32.totalorder %s2828_s28, 0 }
  0x99   : > { %725 = vmatprep.subr.bf16.mxu0 %v1934_v20  ;;  %1753 = vmatprep.subr.bf16.mxu1 %v2334_v0  ;;  %v833_v20 = vrot.slane %v828_v18, %v2625_v15  ;;  %s2338_s22 = smov [#allocation16]  }
  0x9a   : > { %p2199_p13 = pnand %p2198_p4, %p2832_p8  ;;  %s2201_s24 = sshll.u32 %s2338_s22, 4  ;;  %s2202_s24 = int_to_ptr.vmem [resolvable:$false] %s2201_s24 }
  0x9b   : > { %s2203_s30 = scalar_lea.vmem %s2202_s24, 512  ;;  %p2204_p3 = scmp.lt.s32.totalorder %s2685_s13, %s2202_s24 }
  0x9c   : > { %726 = vmatpush1.bf16.msra.mxu0 %v1936_v22  ;;  %1754 = vmatpush3.bf16.msra.mxu1 %v1966_v32  ;;  %v2632_v22 = vsub.s32 1, %v563_v13  ;;  %p2200_p0 = pneg %p2199_p13  ;;  %p2205_p2 = scmp.lt.s32.totalorder %s2203_s30, %s2197_s23 }
  0x9d   : > { %973 = vmatprep.subr.bf16.mxu0 %v1941_v23  ;;  %1759 = vmatprep.subr.bf16.mxu1 %v2334_v0 }
  0x9e   : > { %v569_v28 = vrot.slane %v560_v16, %v2632_v22  ;;  %p2206_p11 = por %p2205_p2, %p2204_p3 }
  0x9f   : > { %744 = vmatmul.mubr.bf16.vlgmr.msra.gmra.mxu0 %v1938_v25  ;;  %1756 = vmatmul.mubr.bf16.vlgmr.msra.gmra.mxu1 %v1938_v25 }
  0xa0   : > { %974 = vmatpush1.bf16.msra.mxu0 %v1939_v26  ;;  %1005 = vmatprep.mubr.bf16.mxu0 %v2335_v1  ;;  %v837_v26 = vrot.slane %v828_v18, %v2632_v22  ;;  %p2207_p10 = pnand %p2206_p11, %p2200_p0 }
  0xa1   : > { %975 = vmatprep.subr.bf16.mxu0 %v1945_v27  ;;  %1760 = vmatpush3.bf16.msra.mxu1 %v1970_v34 }
  0xa2   : > { %1775 = vmatprep.mubr.msk.bf16.mxu1 %vm2336_vm0, %v2334_v0  ;;  %1761 = vmatprep.subr.bf16.mxu1 %v2334_v0 }
  0xa4   : > { %976 = vmatpush1.bf16.msra.mxu0 %v1943_v29 }
  0xa5   : > { %977 = vmatprep.subr.bf16.mxu0 %v1949_v30  ;;  %1762 = vmatpush3.bf16.msra.mxu1 %v1971_v37 }
  0xa6   : > { %1763 = vmatprep.subr.bf16.mxu1 %v2334_v0 }
  0xa8   : > { %978 = vmatpush1.bf16.msra.mxu0 %v1947_v31 }
  0xa9   : > { %979 = vmatprep.subr.bf16.mxu0 %v1953_v33  ;;  %1764 = vmatpush3.bf16.msra.mxu1 %v1972_v40 }
  0xaa   : > { %1765 = vmatprep.subr.bf16.mxu1 %v2334_v0 }
  0xac   : > { %980 = vmatpush1.bf16.msra.mxu0 %v1951_v35 }
  0xad   : > { %981 = vmatprep.subr.bf16.mxu0 %v1957_v36  ;;  %1766 = vmatpush3.bf16.msra.mxu1 %v1973_v43 }
  0xae   : > { %1767 = vmatprep.subr.bf16.mxu1 %v2334_v0 }
  0xb0   : > { %982 = vmatpush1.bf16.msra.mxu0 %v1955_v38 }
  0xb1   : > { %983 = vmatprep.subr.bf16.mxu0 %v1961_v39  ;;  %1768 = vmatpush3.bf16.msra.mxu1 %v1974_v46 }
  0xb2   : > { %1769 = vmatprep.subr.bf16.mxu1 %v2334_v0 }
  0xb4   : > { %984 = vmatpush1.bf16.msra.mxu0 %v1959_v41 }
  0xb5   : > { %985 = vmatprep.subr.bf16.mxu0 %v1965_v42  ;;  %1770 = vmatpush3.bf16.msra.mxu1 %v1975_v50 }
  0xb6   : > { %1771 = vmatprep.subr.bf16.mxu1 %v2334_v0 }
  0xb8   : > { %986 = vmatpush1.bf16.msra.mxu0 %v1963_v44 }
  0xb9   : > { %987 = vmatprep.subr.bf16.mxu0 %v1969_v45  ;;  %1772 = vmatpush3.bf16.msra.mxu1 %v1976_v52 }
  0xba   : > { %1773 = vmatprep.subr.bf16.mxu1 %v2334_v0 }
  0xbc   : > { %988 = vmatpush1.bf16.msra.mxu0 %v1967_v47 }
  0xbd   : > { %1774 = vmatpush3.bf16.msra.mxu1 %v1977_v53  ;;  %1232 = vmatprep.subr.bf16.mxu0 %v1980_v54 }
  0xbf   : > { %1006 = vmatmul.mubr.bf16.vlgmr.msra.gmra.mxu0 %v795_v51 }
  0xc0   : > { %1264 = vmatprep.mubr.bf16.mxu0 %v2335_v1  ;;  %1776 = vmatmul.mubr.bf16.vlgmr.msra.gmra.mxu1 %v795_v51  ;;  %v1995_v1 = vld [vmem:[%s2570_s12 + $0x24] ss:$8 sps:$4 sm:$0xff]   ;;  %s2692_s12 = scalar_lea.hbm %s2799_s8, %s1714_s19 }
  0xc1   : > { %1233 = vmatpush1.bf16.msra.mxu0 %v1978_v55  ;;  %v572_v55 = vsub.s32 2, %v563_v13 }
  0xc2   : > { %1234 = vmatprep.subr.bf16.mxu0 %v1983_v56 }
  0xc3   : > { %v841_v56 = vrot.slane %v828_v18, %v572_v55 }
  0xc5   : > { %1235 = vmatpush1.bf16.msra.mxu0 %v1981_v57 }
  0xc6   : > { %1236 = vmatprep.subr.bf16.mxu0 %v1986_v58 }
  0xc9   : > { %1237 = vmatpush1.bf16.msra.mxu0 %v1984_v59  ;;  %v573_v59 = vrot.slane %v560_v16, %v572_v55 }
  0xca   : > { %1238 = vmatprep.subr.bf16.mxu0 %v1989_v60 }
  0xcd   : > { %1239 = vmatpush1.bf16.msra.mxu0 %v1987_v61 }
  0xce   : > { %1240 = vmatprep.subr.bf16.mxu0 %v1992_v62 }
  0xd1   : > { %1241 = vmatpush1.bf16.msra.mxu0 %v1990_v63 }
  0xd2   : > { %1242 = vmatprep.subr.bf16.mxu0 %v1995_v1 }
  0xd5   : > { %1243 = vmatpush1.bf16.msra.mxu0 %v1993_v2 }
  0xd6   : > { %1244 = vmatprep.subr.bf16.mxu0 %v1998_v3 }
  0xd9   : > { %1245 = vmatpush1.bf16.msra.mxu0 %v1996_v4 }
  0xda   : > { %1246 = vmatprep.subr.bf16.mxu0 %v2001_v5 }
  0xdd   : > { %1247 = vmatpush1.bf16.msra.mxu0 %v1999_v6 }
 0x15f   : > { %v788_v7 = vpop.f32.mrf.mxu1  ;;  %v745_v12 = vpop.f32.mrf.mxu0 }
 0x160   : > { %v746_v24 = vadd.f32 %v745_v12, %v565_v19  ;;  %v789_v1 = vadd.f32 %v788_v7, %v573_v59 }
 0x161   : > { %v1757_v8 = vpop.f32.mrf.mxu1  ;;  %v747_v14 = vpop.f32.mrf.mxu0 }
 0x162   : > { %v748_v36 = vadd.f32 %v747_v14, %v569_v28 }
 0x163   : > { %v2623_v9 = vpop.f32.mrf.mxu1  ;;  %v749_v17 = vpop.f32.mrf.mxu0 }
 0x164   : > { %v750_v31 = vadd.f32 %v749_v17, %v565_v19  ;;  %v792_v6 = vadd.f32 %v2623_v9, %v573_v59 }
 0x165   : > { %v1758_v10 = vpop.f32.mrf.mxu1  ;;  %v751_v21 = vpop.f32.mrf.mxu0 }
 0x166   : > { %v752_v41 = vadd.f32 %v751_v21, %v569_v28 }
 0x17f   : > { %v1007_v23 = vpop.f32.mrf.mxu0 }
 0x180   : > { %v1008_v25 = vadd.f32 %v1007_v23, %v833_v20  ;;  %v1050_v42 = vpop.f32.mrf.mxu1 }
 0x181   : > { %v1009_v27 = vpop.f32.mrf.mxu0  ;;  %v1051_v61 = vadd.f32 %v1050_v42, %v841_v56 }
 0x182   : > { %v1057_v29 = vadd.f32 %v1008_v25, %v746_v24  ;;  %v1010_v33 = vadd.f32 %v1009_v27, %v837_v26  ;;  %v1777_v44 = vpop.f32.mrf.mxu1 }
 0x183   : > { %v1011_v30 = vpop.f32.mrf.mxu0 }
 0x184   : > { %v1675_v32 = vmul.f32 -1.442695, %v1057_v29  ;;  %v1012_v34 = vadd.f32 %v1011_v30, %v833_v20  ;;  %v1071_v39 = vadd.f32 %v1010_v33, %v748_v36  ;;  %v1053_v46 = vpop.f32.mrf.mxu1 }
 0x185   : > { %v1013_v35 = vpop.f32.mrf.mxu0  ;;  %v1054_v4 = vadd.f32 %v1053_v46, %v841_v56 }
 0x186   : > { %2003 = vpow2.f32 %v1675_v32  ;;  %v1058_v37 = vadd.f32 %v1012_v34, %v750_v31  ;;  %v1014_v38 = vadd.f32 %v1013_v35, %v837_v26  ;;  %v1677_v45 = vmul.f32 -1.442695, %v1071_v39  ;;  %v1778_v50 = vpop.f32.mrf.mxu1 }
 0x188   : > { %v1676_v40 = vmul.f32 -1.442695, %v1058_v37  ;;  %v1072_v43 = vadd.f32 %v1014_v38, %v752_v41 }
 0x18a   : > { %2005 = vpow2.f32 %v1676_v40  ;;  %v1678_v47 = vmul.f32 -1.442695, %v1072_v43 }
 0x18b   : > { %2007 = vpow2.f32 %v1677_v45 }
 0x18c   : > { %2009 = vpow2.f32 %v1678_v47 }
 0x193   : > { %v2004_v51 = vpop.eup %2003 }
 0x194   : > { %v1065_v52 = vadd.f32 1.0, %v2004_v51 }
 0x196   : > { %2011 = vrcp.f32 %v1065_v52 }
 0x197   : > { %v2006_v53 = vpop.eup %2005 }
 0x198   : > { %v1066_v54 = vadd.f32 1.0, %v2006_v53  ;;  %v2008_v57 = vpop.eup %2007 }
 0x199   : > { %v2010_v58 = vpop.eup %2009  ;;  %v1079_v60 = vadd.f32 1.0, %v2008_v57 }
 0x19a   : > { %2013 = vrcp.f32 %v1066_v54  ;;  %v1080_v63 = vadd.f32 1.0, %v2010_v58 }
 0x19b   : > { %2015 = vrcp.f32 %v1079_v60 }
 0x19c   : > { %2017 = vrcp.f32 %v1080_v63 }
 0x1a3   : > { %v2012_v62 = vpop.eup %2011 }
 0x1a4   : > { %v1085_v2 = vmul.f32 %v2012_v62, %v1051_v61 }
 0x1a6   : > { %v1087_v3 = vadd.f32 %v1085_v2, %v789_v1 }
 0x1a7   : > { %v2014_v5 = vpop.eup %2013 }
 0x1a8   : > { %2019 = vtanh.f32 %v1087_v3  ;;  %v1086_v8 = vmul.f32 %v2014_v5, %v1054_v4  ;;  %v2016_v11 = vpop.eup %2015 }
 0x1a9   : > { %v2018_v12 = vpop.eup %2017  ;;  %v1091_v13 = vsub.f32 1.0, %v2016_v11  ;;  %v1095_v7 = vmul.f32 %v2016_v11, %v2597_v48  ;;  %v2337_v48 = vmov -1e+30  }
 0x1aa   : > { %v1088_v10 = vadd.f32 %v1086_v8, %v792_v6  ;;  %v1092_v18 = vsub.f32 1.0, %v2018_v12  ;;  %v1096_v20 = vmul.f32 %v2018_v12, %v2599_v49  ;;  %1112 = vst.msk [vmem:[#allocation2] sm:$0xff] %vm1111_vm1, %v2337_v48  ;;  %1113 = vst.msk [vmem:[#allocation2 + $0x8] sm:$0xff] %vm1111_vm1, %v2337_v48  ;;  %v1134_v49 = vld [vmem:[%s509_s11] sm:$0x3] }
 0x1ab   : > { %v1139_v25 = vrot.slane %v1134_v49, %v2625_v15  ;;  %v1143_v26 = vrot.slane %v1134_v49, %v2632_v22 }
 0x1ac   : > { %2021 = vtanh.f32 %v1088_v10 }
 0x1b1   : > { %v2664_v22 = vld [vmem:[#allocation2] sm:$0xff]  ;;  %v2669_v39 = vld [vmem:[#allocation2 + $0x8] sm:$0xff] }
 0x1b5   : > { %v2020_v14 = vpop.eup %2019 }
 0x1b6   : > { %v1093_v16 = vmul.f32 %v2020_v14, %v1091_v13 }
 0x1b8   : > { %v1097_v17 = vadd.f32 %v1095_v7, %v1093_v16 }
 0x1b9   : > { %v2022_v19 = vpop.eup %2021 }
 0x1ba   : > { %v1094_v9 = vmul.f32 %v2022_v19, %v1092_v18  ;;  %1099 = vst [vmem:[%s2642_s3] sm:$0xff] %v1097_v17 }
 0x1bc   : > { %v1098_v21 = vadd.f32 %v1096_v20, %v1094_v9 }
 0x1be   : > { %v1719_v23 = vpack.c.bf16 %v1098_v21, %v1097_v17  ;;  %1100 = vst [vmem:[%s2642_s3 + $0x8] sm:$0xff] %v1098_v21 }
 0x1c0   : > { %1720 = vst [vmem:[#allocation4] sm:$0xff] %v1719_v23  }
 0x1c7   : > { %v2002_v24 = vld [vmem:[#allocation4] sm:$0xff]  }
 0x1c8   : > { %1265 = vmatmul.mubr.bf16.vlgmr.msra.gmra.mxu0 %v2002_v24 }
 0x288   : > { %v1266_v27 = vpop.f32.mrf.mxu0 }
 0x289   : > { %v1267_v29 = vadd.f32 %v1266_v27, %v1139_v25 }
 0x28a   : > { %v1268_v28 = vpop.f32.mrf.mxu0 }
 0x28b   : > { %v1269_v30 = vadd.f32 %v1268_v28, %v1143_v26 }
 0x28c   : > { %v1270_v31 = vpop.f32.mrf.mxu0 }
 0x28d   : > { %v1712_v32 = vpack.c.bf16 %v1269_v30, %v1267_v29  ;;  %v1291_v0 = vmax.f32 %v1267_v29, %v1269_v30  ;;  %v1271_v34 = vadd.f32 %v1270_v31, %v1139_v25 }
 0x28e   : > { %v1272_v33 = vpop.f32.mrf.mxu0 }
 0x28f   : > { %1287 = vst [vmem:[%s2660_s27] sm:$0xff] %v1712_v32  ;;  %v1273_v35 = vadd.f32 %v1272_v33, %v1143_v26  ;;  %1292 = vmax.xlane.f32.xlu0 %v1291_v0 }
 0x291   : > { %v1713_v15 = vpack.c.bf16 %v1273_v35, %v1271_v34  ;;  %v1294_v36 = vmax.f32 %v1271_v34, %v1273_v35 }
 0x293   : > { %1288 = vst [vmem:[%s2660_s27 + $0x8] sm:$0xff] %v1713_v15  ;;  %1295 = vmax.xlane.f32.xlu0 %v1294_v36 }
 0x318   : > { %v1293_v37 = vpop.xlane.xlu0 %1292 }
 0x319   : > { %v2667_v38 = vmax.f32 %v2664_v22, %v1293_v37 }
 0x31b   : > { %v1301_v40 = vsub.f32 %v2664_v22, %v2667_v38  ;;  %1342 = vst.msk [vmem:[#allocation2] sm:$0xff] %vm1111_vm1, %v2667_v38  ;;  %1311 = vperm.xlu1 %1911, %v2667_v38  }
 0x31c   : > { %v1296_v41 = vpop.xlane.xlu0 %1295 }
 0x31d   : > { %v2677_v42 = vmax.f32 %v2669_v39, %v1296_v41 }
 0x31f   : > { %v1302_v43 = vsub.f32 %v2669_v39, %v2677_v42  ;;  %1343 = vst.msk [vmem:[#allocation2 + $0x8] sm:$0xff] %vm1111_vm1, %v2677_v42  ;;  %1316 = vperm.xlu1 %1911, %v2677_v42  }
 0x396   : > { %v1312_v44 = vpop.permute.xlu1 %1311 }
 0x397   : > { %v1319_v45 = vsub.f32 %v1267_v29, %v1312_v44  ;;  %v1320_v46 = vsub.f32 %v1269_v30, %v1312_v44 }
 0x399   : > { %v1323_v47 = vmul.f32 1.442695, %v1319_v45  ;;  %v1325_v50 = vmul.f32 1.442695, %v1320_v46 }
 0x39a   : > { %v1317_v51 = vpop.permute.xlu1 %1316 }
 0x39b   : > { %2023 = vpow2.f32 %v1323_v47  ;;  %v1321_v52 = vsub.f32 %v1271_v34, %v1317_v51  ;;  %v1322_v53 = vsub.f32 %v1273_v35, %v1317_v51 }
 0x39c   : > { %2025 = vpow2.f32 %v1325_v50 }
 0x39d   : > { %v1327_v54 = vmul.f32 1.442695, %v1321_v52  ;;  %v1329_v55 = vmul.f32 1.442695, %v1322_v53 }
 0x39f   : > { %2027 = vpow2.f32 %v1327_v54 }
 0x3a0   : > { %2029 = vpow2.f32 %v1329_v55 }
 0x3a8   : > { %v2024_v56 = vpop.eup %2023 }
 0x3a9   : > { %v2026_v57 = vpop.eup %2025 }
 0x3aa   : > { %v1331_v58 = vadd.f32 %v2026_v57, %v2024_v56 }
 0x3ac   : > { %v2028_v59 = vpop.eup %2027  ;;  %1332 = vadd.xlane.f32.xlu0 %v1331_v58 }
 0x3ad   : > { %v2030_v60 = vpop.eup %2029 }
 0x3ae   : > { %v1334_v61 = vadd.f32 %v2030_v60, %v2028_v59 }
 0x3b0   : > { %1335 = vadd.xlane.f32.xlu1 %v1334_v61 }
 0x3b1   : > { %2210 = shalt.err (!%p2207_p10)
}
 0x3b2   : > { %s2211_s20 = scalar_lea.hbm %s2692_s12, 256  ;;  %s2215_s19 = scalar_lea.hbm %s2799_s8, 512 }
 0x3b3   : > { %p2212_p7 = scmp.ne.s32.totalorder %s2692_s12, %s2211_s20  ;;  %p2216_p9 = scmp.lt.s32.totalorder %s2692_s12, %s2799_s8 }
 0x3b4   : > { %p2217_p5 = scmp.lt.s32.totalorder %s2215_s19, %s2211_s20 }
 0x3b5   : > { %p2213_p6 = pnand %p2212_p7, %p2832_p8 }
 0x3b6   : > { %p2218_p1 = por %p2217_p5, %p2216_p9 }
 0x3b7   : > { %p2214_p12 = pneg %p2213_p6 }
 0x3b9   : > { %p2219_p4 = pnand %p2218_p1, %p2214_p12 }
 0x3bb   : > { %2222 = shalt.err (!%p2219_p4)
}
 0x3bc   : > { %s2339_s23 = smov 128   ;;  %s2340_s22 = smov 256  }
 0x3bd   : > { %s2341_s24 = smov 8   ;;  %s2724_s11 = scalar_lea.hbm %s2801_s10, %s1715_s29 }
 0x3be   : > { %1801 = dma.vmem_to_hbm [thread:$0]  (%p2832_p8), %s2685_s13, 256, %s2692_s12, %s1360_s21, %s2339_s23, %s2340_s22, %s2341_s24  }
 0x3bf   : > { %s1403_s27 = sshll.u32 %s2642_s3, 4  ;;  %s1370_s19 = scalar_lea.sflag [#allocation18], %s2566_s0  ;;  %s2727_s27 = int_to_ptr.vmem [resolvable:$true] %s1403_s27 }
 0x3c0   : > { %s2223_s2 = scalar_lea.vmem %s2727_s27, 256  ;;  %s2342_s25 = smov [#allocation17]  }
 0x3c1   : > { %p2224_p13 = scmp.ne.s32.totalorder %s2727_s27, %s2223_s2  ;;  %s2227_s13 = sshll.u32 %s2342_s25, 4  ;;  %s2228_s13 = int_to_ptr.vmem [resolvable:$false] %s2227_s13 }
 0x3c2   : > { %s2229_s12 = scalar_lea.vmem %s2228_s13, 512  ;;  %p2230_p2 = scmp.lt.s32.totalorder %s2727_s27, %s2228_s13 }
 0x3c3   : > { %p2225_p0 = pnand %p2224_p13, %p2832_p8  ;;  %p2231_p11 = scmp.lt.s32.totalorder %s2229_s12, %s2223_s2 }
 0x3c5   : > { %p2226_p3 = pneg %p2225_p0  ;;  %p2232_p10 = por %p2231_p11, %p2230_p2 }
 0x3c7   : > { %p2233_p7 = pnand %p2232_p10, %p2226_p3 }
 0x3c9   : > { %2236 = shalt.err (!%p2233_p7)
}
 0x3ca   : > { %s2237_s3 = scalar_lea.hbm %s2724_s11, 256  ;;  %s2241_s21 = scalar_lea.hbm %s2801_s10, 512 }
 0x3cb   : > { %p2238_p6 = scmp.ne.s32.totalorder %s2724_s11, %s2237_s3  ;;  %p2242_p5 = scmp.lt.s32.totalorder %s2724_s11, %s2801_s10 }
 0x3cc   : > { %p2243_p1 = scmp.lt.s32.totalorder %s2241_s21, %s2237_s3 }
 0x3cd   : > { %p2239_p12 = pnand %p2238_p6, %p2832_p8 }
 0x3ce   : > { %p2244_p4 = por %p2243_p1, %p2242_p5 }
 0x3cf   : > { %p2240_p9 = pneg %p2239_p12 }
 0x3d1   : > { %p2245_p13 = pnand %p2244_p4, %p2240_p9 }
 0x3d3   : > { %2248 = shalt.err (!%p2245_p13)
}
 0x3d4   : > { %1802 = dma.vmem_to_hbm [thread:$0]  (%p2832_p8), %s2727_s27, 256, %s2724_s11, %s1370_s19, %s2339_s23, %s2339_s23, %s2341_s24   ;;  %v1303_v62 = vmul.f32 1.442695, %v1301_v40  ;;  %v1305_v63 = vmul.f32 1.442695, %v1302_v43  ;;  %v1299_v2 = vld [vmem:[#allocation3] sm:$0xff] }
 0x3d5   : > { %v1300_v6 = vld [vmem:[#allocation3 + $0x8] sm:$0xff]  ;;  %p514_p8 = scmp.lt.s32.totalorder %s2311_s16, 1  ;;  %v1347_v17 = vld [vmem:[#allocation2] sm:$0xff]  ;;  %v1348_v9 = vld [vmem:[#allocation2 + $0x8] sm:$0xff] }
 0x3d6   : > { %2031 = vpow2.f32 %v1303_v62 }
 0x3d7   : > { %2033 = vpow2.f32 %v1305_v63  ;;  %s2847_s16 = smov (!%p514_p8, %s2311_s16), 1 }
 0x3d8   : > { %s1709_s28 = sshll.u32 %s2847_s16, 4 }
 0x3d9   : > { %s518_s20 = scalar_lea.vmem %s2800_s9, %s1709_s28 }
 0x3e3   : > { %v2032_v1 = vpop.eup %2031 }
 0x3e4   : > { %v1307_v3 = vmul.f32 %v2032_v1, %v1299_v2  ;;  %v2034_v4 = vpop.eup %2033 }
 0x3e5   : > { %v1308_v10 = vmul.f32 %v2034_v4, %v1300_v6 }
 0x435   : > { %v1333_v5 = vpop.xlane.xlu0 %1332 }
 0x436   : > { %v1337_v8 = vadd.f32 %v1333_v5, %v1307_v3 }
 0x438   : > { %1340 = vst.msk [vmem:[#allocation3] sm:$0xff] %vm1111_vm1, %v1337_v8 }
 0x439   : > { %v1336_v11 = vpop.xlane.xlu1 %1335 }
 0x43a   : > { %v1338_v12 = vadd.f32 %v1336_v11, %v1308_v10 }
 0x43c   : > { %1341 = vst.msk [vmem:[#allocation3 + $0x8] sm:$0xff] %vm1111_vm1, %v1338_v12 }
 0x43f   : > { %v1349_v13 = vld [vmem:[#allocation3] sm:$0xff] }
 0x440   : > { %2035 = vlog2.f32 %v1349_v13 }
 0x443   : > { %v1350_v14 = vld [vmem:[#allocation3 + $0x8] sm:$0xff] }
 0x444   : > { %2037 = vlog2.f32 %v1350_v14 }
 0x44d   : > { %v2036_v7 = vpop.eup %2035 }
 0x44e   : > { %v1352_v16 = vmul.f32 0.6931472, %v2036_v7 }
 0x450   : > { %v1355_v18 = vadd.f32 %v1352_v16, %v1347_v17 }
 0x451   : > { %v2038_v19 = vpop.eup %2037 }
 0x452   : > { %1357 = vst.msk [vmem:[%s518_s20] sm:$0xff] %vm1111_vm1, %v1355_v18  ;;  %v1354_v20 = vmul.f32 0.6931472, %v2038_v19 }
 0x454   : > { %v1356_v21 = vadd.f32 %v1354_v20, %v1348_v9 }
 0x456   : > { %1358 = vst.msk [vmem:[%s518_s20 + $0x8] sm:$0xff] %vm1111_vm1, %v1356_v21 }
 0x457 PF: > { %s2833_s11 = sld [smem:[#allocation25_spill]]  ;;  %p2836_p3 = scmp.ge.s32.totalorder %s2319_s18, 2 }
 0x458   : > { %s2834_s27 = sld [smem:[#allocation26_spill]] }
 0x45d   : > { %s1418_s16 = sand.u32 1, %s2833_s11  }
 0x45e   : > { %p2835_p0 = scmp.ne.s32.totalorder %s2834_s27, 0  ;;  %s1419_s19 = scalar_lea.sflag [#allocation7], %s1418_s16 }
 0x460   : > { %p1826_p2 = pnand %p2836_p3, %p2835_p0 }
 0x462   : > { %p1827_p11 = pneg %p1826_p2 }
 0x464   : > { %2290 = dma.done.wait (%p1827_p11), %s1419_s19, 256  }
 0x465   : > { %2292 = vsyncadd (%p1827_p11), %s1419_s19, 4294967040  ;;  %s1436_s2 = scalar_lea.sflag [#allocation18], %s1418_s16 }
 0x466   : > { %2294 = dma.done.wait (%p1827_p11), %s1436_s2, 256  }
 0x467   : > { %2296 = vsyncadd (%p1827_p11), %s1436_s2, 4294967040  ;;  %s33_s18 = sadd.s32 1, %s2319_s18   ;;  %s2837_s13 = smov %s2303_s14 }
 0x468   : > { %p30_p10 = scmp.ge.s32.totalorder %s33_s18, 4   ;;  %s2838_s14 = smov %s2307_s15 }
 0x469   : > { %s2839_s15 = smov %s2534_s1  ;;  %s2840_s16 = smov %s2315_s17 }
 0x46a   : > { %s2841_s17 = smov %s2843_s26  ;;  %32 = sbr.rel (!%p30_p10) target bundleno = 16 (0x10), region = 158 }
 0x46f   :  { %1441 = vsyncpa [#allocation6], 1 }
 0x470   :  { %1443 = vsyncpa [#allocation6 + $0x1], 1 }
 0x471   :  { %1444 = vsyncpa [#allocation9], 1 }
 0x472   :  { %1445 = vsyncpa [#allocation12], 1 }
 0x473   :  { %1446 = vsyncpa [#allocation15], 1 }
 0x474   :  { %1448 = vsyncpa [#allocation15 + $0x1], 1 }
 0x475   :  { %1449 = vsyncpa [#allocation7], 1 }
 0x476   :  { %1451 = vsyncpa [#allocation7 + $0x1], 1 }
 0x477   :  { %1452 = vsyncpa [#allocation18], 1 }
 0x478   :  { %1454 = vsyncpa [#allocation18 + $0x1], 1 }

</bundles_post_ra>
